<compile_context>
chip_gen: v7x
topology: tpu7x:2x2x1
jax: 0.10.0
libtpu: 0.0.40
codegen_flags: <defaults>
</compile_context>

<pallas_src>
import numpy as np
import jax
import jax.numpy as jnp
from jax.experimental import pallas as pl
from jax.experimental.pallas import tpu as pltpu

HIDDEN = 32
LAYERS = 2
NFEAT = 8
EFEAT = 8
NUM_TASKS = 1
BN_EPS = 1e-5

LANE = 128                                   # node / edge / graph axes padded to this
TASK_PAD = 8                                 # padded sublane count of the output store
K_PAD = max(2 * HIDDEN, NFEAT, EFEAT)        # column width of the packed weight slab

# ---- packed weight slab row offsets (weights stored TRANSPOSED: [fan_out, fan_in]) ----
OFF_W_ATOM = 0                               # H rows,      NFEAT cols
OFF_W_EDGE = OFF_W_ATOM + HIDDEN             # L*H rows,    EFEAT cols  (hoisted edge lin)
OFF_W_NODE = OFF_W_EDGE + LAYERS * HIDDEN    # L*H rows,    H cols
OFF_W_M1A = OFF_W_NODE + LAYERS * HIDDEN     # L*2H rows,   H cols      (mlp1, vn half)
OFF_W_M1B = OFF_W_M1A + LAYERS * 2 * HIDDEN  # L*2H rows,   H cols      (mlp1, h half)
OFF_W_M2 = OFF_W_M1B + LAYERS * 2 * HIDDEN   # L*H rows,    2H cols
OFF_W_P1 = OFF_W_M2 + LAYERS * HIDDEN        # H rows,      H cols
OFF_W_P2 = OFF_W_P1 + HIDDEN                 # TASK_PAD rows, H cols
W_ROWS = OFF_W_P2 + TASK_PAD

# ---- packed bias slab row offsets (biases stored as [fan_out, 1] f32 columns) ----
OFF_B_ATOM = 0
OFF_B_EDGE = OFF_B_ATOM + HIDDEN
OFF_B_NODE = OFF_B_EDGE + LAYERS * HIDDEN
OFF_B_M1 = OFF_B_NODE + LAYERS * HIDDEN
OFF_B_M2 = OFF_B_M1 + LAYERS * 2 * HIDDEN
OFF_B_P1 = OFF_B_M2 + LAYERS * HIDDEN
OFF_B_P2 = OFF_B_P1 + HIDDEN
B_ROWS = OFF_B_P2 + TASK_PAD


# ---------------------------------------------------------------------------
# Single fused kernel: the entire EXPC forward pass, transposed / lane-dense.
# ---------------------------------------------------------------------------
def _expc_kernel(xT_ref, eaT_ref, idx_row_ref, idx_col_ref, w_ref, b_ref, out_ref):
    f32, bf16 = jnp.float32, jnp.bfloat16
    H, L = HIDDEN, LAYERS
    N = xT_ref.shape[1]          # padded node count  (lane axis)
    E = eaT_ref.shape[1]         # padded edge count  (lane axis)
    Gp = out_ref.shape[1]        # padded graph count (lane axis)

    def W(r0, rows, cols):       # bf16 transposed weight slice from the slab
        return w_ref[r0:r0 + rows, :cols]

    def B(r0, rows):             # f32 bias column [fan_out, 1], broadcast over lanes
        return b_ref[r0:r0 + rows, :]

    def onehot_bf16(cond):
        # i1 -> f32 -> bf16 keeps the conversion on known-good lowering paths.
        return cond.astype(f32).astype(bf16)

    def mm(a_bf16, b_bf16):      # bf16 operands, f32 MXU accumulation
        return jnp.dot(a_bf16, b_bf16, preferred_element_type=f32)

    # ---- int32 index vectors; padding entries are -1 -> all-zero one-hot rows/cols ----
    src_row = idx_row_ref[:, :E]              # [1, E]
    batch_row = idx_row_ref[:, E:E + N]       # [1, N]
    dst_col = idx_col_ref[:E, :]              # [E, 1]
    batch_col = idx_col_ref[E:E + N, :]       # [N, 1]

    # ---- one-hot incidence matrices built in-register (exact 0/1 in bf16) ----
    g_src = onehot_bf16(jax.lax.broadcasted_iota(jnp.int32, (N, E), 0) == src_row)    # n == src[e]
    g_dst = onehot_bf16(jax.lax.broadcasted_iota(jnp.int32, (E, N), 1) == dst_col)    # n == dst[e]
    g_gn = onehot_bf16(jax.lax.broadcasted_iota(jnp.int32, (Gp, N), 0) == batch_row)  # g == batch[n]
    g_ng = onehot_bf16(jax.lax.broadcasted_iota(jnp.int32, (N, Gp), 1) == batch_col)  # g == batch[n]

    # ---- atom encoder: hT [H, N] ----
    hT = mm(W(OFF_W_ATOM, H, NFEAT), xT_ref[...]) + B(OFF_B_ATOM, H)

    # ---- edge linear hoisted out of the layer loop: all layers in one matmul [L*H, E] ----
    e_all = mm(W(OFF_W_EDGE, L * H, EFEAT), eaT_ref[...]) + B(OFF_B_EDGE, L * H)

    # ---- virtual node (Embedding(1, H) initialized to 0), transposed: [H, Gp] ----
    vnT = jnp.zeros((H, Gp), f32)

    for l in range(L):                                   # static loop, unrolled at trace
        # vn[batch] broadcast to nodes
        vn_pnT = mm(vnT.astype(bf16), g_gn)              # [H, N]
        hT = hT + vn_pnT
        h_bf = hT.astype(bf16)                           # bf16 shadow (reused below)

        # --- CombConv stand-in (see TODO(synk)) ---
        x_srcT = mm(h_bf, g_src)                         # gather x[src]       [H, E]
        msgsT = jnp.maximum(e_all[l * H:(l + 1) * H, :] + x_srcT, 0.0)
        aggT = mm(msgsT.astype(bf16), g_dst)             # scatter-add to dst  [H, N]
        hT = jnp.maximum(
            mm(W(OFF_W_NODE + l * H, H, H), (hT + aggT).astype(bf16))
            + B(OFF_B_NODE + l * H, H), 0.0)
        h_bf = hT.astype(bf16)                           # refresh bf16 shadow

        # --- mlp1 on cat([vn[batch], h]) WITHOUT the concat: split-weight matmuls ---
        tmpT = jnp.maximum(
            mm(W(OFF_W_M1A + l * 2 * H, 2 * H, H), vn_pnT.astype(bf16))
            + mm(W(OFF_W_M1B + l * 2 * H, 2 * H, H), h_bf)
            + B(OFF_B_M1 + l * 2 * H, 2 * H), 0.0)       # [2H, N]

        # --- global_add_pool + mlp2 (BN folded, eval; dropout = identity) ---
        pooledT = mm(tmpT.astype(bf16), g_ng)            # [2H, Gp]
        vnT = jnp.maximum(
            mm(W(OFF_W_M2 + l * H, H, 2 * H), pooledT.astype(bf16))
            + B(OFF_B_M2 + l * H, H), 0.0)               # [H, Gp]

    # ---- JK = 'L'; prediction head.  Lane-dense [TASK_PAD, Gp] full-vreg store. ----
    hgT = jnp.maximum(mm(W(OFF_W_P1, H, H), vnT.astype(bf16)) + B(OFF_B_P1, H), 0.0)
    out_ref[...] = mm(W(OFF_W_P2, TASK_PAD, H), hgT.astype(bf16)) + B(OFF_B_P2, TASK_PAD)


# ---------------------------------------------------------------------------
# Deterministic parameter init (shapes follow the PyTorch module __init__),
# BatchNorm (eval, fresh-init stats) folded into the Linear weights, everything
# packed into ONE bf16 weight slab + ONE f32 bias slab.
# ---------------------------------------------------------------------------
def init_params(key):
    def lin_p(k, fan_in, fan_out):
        kw, kb = jax.random.split(k)
        w = jax.random.normal(kw, (fan_in, fan_out), jnp.float32) * 0.1
        b = jax.random.normal(kb, (fan_out,), jnp.float32) * 0.01
        return w, b

    keys = jax.random.split(key, 3 + 4 * LAYERS)
    atom_w, atom_b = lin_p(keys[0], NFEAT, HIDDEN)
    pred1_w, pred1_b = lin_p(keys[1], HIDDEN, HIDDEN)
    pred2_w, pred2_b = lin_p(keys[2], HIDDEN, NUM_TASKS)

    # BatchNorm eval folding (fresh init: mean=0, var=1, gamma=1, beta=0).
    bn_scale = 1.0 / jnp.sqrt(1.0 + BN_EPS)

    w_slab = jnp.zeros((W_ROWS, K_PAD), jnp.float32)
    b_slab = jnp.zeros((B_ROWS, 1), jnp.float32)

    def put_w(slab, off, w):                 # store transposed: [fan_out, fan_in]
        wt = w.T
        return slab.at[off:off + wt.shape[0], :wt.shape[1]].set(wt)

    def put_b(slab, off, b):
        return slab.at[off:off + b.shape[0], 0].set(b)

    w_slab = put_w(w_slab, OFF_W_ATOM, atom_w)
    b_slab = put_b(b_slab, OFF_B_ATOM, atom_b)
    w_slab = put_w(w_slab, OFF_W_P1, pred1_w)
    b_slab = put_b(b_slab, OFF_B_P1, pred1_b)
    w_slab = put_w(w_slab, OFF_W_P2, pred2_w)        # rows NUM_TASKS..TASK_PAD stay 0
    b_slab = put_b(b_slab, OFF_B_P2, pred2_b)

    for l in range(LAYERS):
        k0, k1, k2, k3 = keys[3 + 4 * l: 3 + 4 * l + 4]
        ce_w, ce_b = lin_p(k0, EFEAT, HIDDEN)
        cn_w, cn_b = lin_p(k1, HIDDEN, HIDDEN)
        m1_w, m1_b = lin_p(k2, 2 * HIDDEN, 2 * HIDDEN)
        m2_w, m2_b = lin_p(k3, 2 * HIDDEN, HIDDEN)
        m1_w, m1_b = m1_w * bn_scale, m1_b * bn_scale        # BN folded
        m2_w, m2_b = m2_w * bn_scale, m2_b * bn_scale        # BN folded

        w_slab = put_w(w_slab, OFF_W_EDGE + l * HIDDEN, ce_w)
        b_slab = put_b(b_slab, OFF_B_EDGE + l * HIDDEN, ce_b)
        w_slab = put_w(w_slab, OFF_W_NODE + l * HIDDEN, cn_w)
        b_slab = put_b(b_slab, OFF_B_NODE + l * HIDDEN, cn_b)
        # split mlp1: rows :H act on vn[batch], rows H: act on h  (removes the concat)
        w_slab = put_w(w_slab, OFF_W_M1A + l * 2 * HIDDEN, m1_w[:HIDDEN, :])
        w_slab = put_w(w_slab, OFF_W_M1B + l * 2 * HIDDEN, m1_w[HIDDEN:, :])
        b_slab = put_b(b_slab, OFF_B_M1 + l * 2 * HIDDEN, m1_b)
        w_slab = put_w(w_slab, OFF_W_M2 + l * HIDDEN, m2_w)
        b_slab = put_b(b_slab, OFF_B_M2 + l * HIDDEN, m2_b)

    return {"w_slab": w_slab.astype(jnp.bfloat16), "b_slab": b_slab}


# ---------------------------------------------------------------------------
# Wrapper: one pallas_call, whole arrays VMEM-resident, 6 inputs, no grid.
# ---------------------------------------------------------------------------
def _round_up(v, m):
    return ((v + m - 1) // m) * m


def expc_forward(params, x, edge_index, edge_attr, batch, num_graphs):
    n_nodes, n_edges = x.shape[0], edge_attr.shape[0]
    n_pad = _round_up(n_nodes, LANE)
    e_pad = _round_up(n_edges, LANE)
    g_pad = _round_up(num_graphs, LANE)

    # Transposed, bf16, lane-padded activations (feature on sublanes, entity on lanes).
    xT = jnp.zeros((NFEAT, n_pad), jnp.bfloat16).at[:, :n_nodes].set(
        x.T.astype(jnp.bfloat16))
    eaT = jnp.zeros((EFEAT, e_pad), jnp.bfloat16).at[:, :n_edges].set(
        edge_attr.T.astype(jnp.bfloat16))

    # Index vectors packed into one row-array and one column-array.  Padding uses the
    # explicit sentinel -1: inside the kernel it compares false against every (>=0)
    # iota value, so padded nodes/edges/graphs neither gather, scatter nor pool.
    src = jnp.full((e_pad,), -1, jnp.int32).at[:n_edges].set(edge_index[0].astype(jnp.int32))
    dst = jnp.full((e_pad,), -1, jnp.int32).at[:n_edges].set(edge_index[1].astype(jnp.int32))
    bat = jnp.full((n_pad,), -1, jnp.int32).at[:n_nodes].set(batch.astype(jnp.int32))
    idx_row = jnp.concatenate([src, bat]).reshape(1, e_pad + n_pad)
    idx_col = jnp.concatenate([dst, bat]).reshape(e_pad + n_pad, 1)

    vmem = pl.BlockSpec(memory_space=pltpu.MemorySpace.VMEM)
    out_t = pl.pallas_call(
        _expc_kernel,
        out_shape=jax.ShapeDtypeStruct((TASK_PAD, g_pad), jnp.float32),
        in_specs=[vmem] * 6,
        out_specs=vmem,
        # Explicit scoped-VMEM budget (v5e defaults to 16 MiB; 32 MiB is safe on
        # v5e/v6e/v7x).  Raise for larger graphs, sized for the v7x 64 MiB ceiling.
        compiler_params=pltpu.CompilerParams(vmem_limit_bytes=32 * 1024 * 1024),
    )(xT, eaT, idx_row, idx_col, params["w_slab"], params["b_slab"])
    return out_t[:NUM_TASKS, :num_graphs].T        # [num_graphs, NUM_TASKS]


# ---------------------------------------------------------------------------
# Pure-JAX f32 reference (same folded weights) for a tolerance check.
# ---------------------------------------------------------------------------
def expc_reference_f32(params, x, edge_index, edge_attr, batch, num_graphs):
    w = params["w_slab"].astype(jnp.float32)
    b = params["b_slab"][:, 0]
    H, L = HIDDEN, LAYERS

    def W(off, rows, cols):                    # back to [fan_in, fan_out]
        return w[off:off + rows, :cols].T

    def Bv(off, rows):
        return b[off:off + rows]

    src, dst = edge_index[0], edge_index[1]
    h = x @ W(OFF_W_ATOM, H, NFEAT) + Bv(OFF_B_ATOM, H)
    vn = jnp.zeros((num_graphs, H), jnp.float32)
    for l in range(L):
        vn_pn = vn[batch]
        h = h + vn_pn
        msgs = jnp.maximum(
            edge_attr @ W(OFF_W_EDGE + l * H, H, EFEAT) + Bv(OFF_B_EDGE + l * H, H)
            + h[src], 0.0)
        agg = jax.ops.segment_sum(msgs, dst, num_segments=x.shape[0])
        h = jnp.maximum((h + agg) @ W(OFF_W_NODE + l * H, H, H)
                        + Bv(OFF_B_NODE + l * H, H), 0.0)
        tmp = jnp.maximum(
            vn_pn @ W(OFF_W_M1A + l * 2 * H, 2 * H, H)
            + h @ W(OFF_W_M1B + l * 2 * H, 2 * H, H)
            + Bv(OFF_B_M1 + l * 2 * H, 2 * H), 0.0)
        pooled = jax.ops.segment_sum(tmp, batch, num_segments=num_graphs)
        vn = jnp.maximum(pooled @ W(OFF_W_M2 + l * H, H, 2 * H)
                         + Bv(OFF_B_M2 + l * H, H), 0.0)
    hg = jnp.maximum(vn @ W(OFF_W_P1, H, H) + Bv(OFF_B_P1, H), 0.0)
    out = hg @ W(OFF_W_P2, TASK_PAD, H) + Bv(OFF_B_P2, TASK_PAD)
    return out[:, :NUM_TASKS]


# ---------------------------------------------------------------------------
if __name__ == "__main__":
    key = jax.random.PRNGKey(0)
    k_param, k_x, k_e, k_src, k_dst = jax.random.split(key, 5)

    N = 16   # nodes
    E = 32   # edges
    G = 2    # graphs

    params = init_params(k_param)

    x = jax.random.normal(k_x, (N, NFEAT), jnp.float32)
    edge_attr = jax.random.normal(k_e, (E, EFEAT), jnp.float32)
    batch = jnp.concatenate([jnp.zeros((N // 2,), jnp.int32),
                             jnp.ones((N // 2,), jnp.int32)])
    # edges kept within each graph
    src0 = jax.random.randint(k_src, (E // 2,), 0, N // 2)
    dst0 = jax.random.randint(k_dst, (E // 2,), 0, N // 2)
    src = jnp.concatenate([src0, src0 + N // 2]).astype(jnp.int32)
    dst = jnp.concatenate([dst0, dst0 + N // 2]).astype(jnp.int32)
    edge_index = jnp.stack([src, dst], axis=0)

    fwd = jax.jit(expc_forward, static_argnums=(5,))
    out = jax.block_until_ready(fwd(params, x, edge_index, edge_attr, batch, G))
    assert out.shape == (G, NUM_TASKS)

    # Tolerance check vs. a pure-JAX f32 reference (bf16 activations -> loose tol).
    ref = expc_reference_f32(params, x, edge_index, edge_attr, batch, G)
    np.testing.assert_allclose(np.asarray(out), np.asarray(ref), rtol=1e-1, atol=5e-3)

    print("KERNEL_OK")
</pallas_src>

<mosaic_0001>
module attributes {stable_mosaic.version = 11 : i64} {
  func.func @_expc_kernel(%arg0: memref<8x128xbf16, #tpu.memory_space<vmem>>, %arg1: memref<8x128xbf16, #tpu.memory_space<vmem>>, %arg2: memref<1x256xi32, #tpu.memory_space<vmem>>, %arg3: memref<256x1xi32, #tpu.memory_space<vmem>>, %arg4: memref<520x64xbf16, #tpu.memory_space<vmem>>, %arg5: memref<392x1xf32, #tpu.memory_space<vmem>>, %arg6: memref<8x128xf32, #tpu.memory_space<vmem>>) attributes {dimension_semantics = [], scalar_prefetch = 0 : i64, scratch_operands = 0 : i64, tpu.core_type = #tpu.core_type<tc>} {
    %c0 = arith.constant 0 : index
    %c0_0 = arith.constant 0 : index
    %0 = vector.load %arg2[%c0, %c0_0] : memref<1x256xi32, #tpu.memory_space<vmem>>, vector<1x128xi32>
    %c0_1 = arith.constant 0 : index
    %c128 = arith.constant 128 : index
    %1 = vector.load %arg2[%c0_1, %c128] : memref<1x256xi32, #tpu.memory_space<vmem>>, vector<1x128xi32>
    %c0_2 = arith.constant 0 : index
    %c0_3 = arith.constant 0 : index
    %2 = vector.load %arg3[%c0_2, %c0_3] : memref<256x1xi32, #tpu.memory_space<vmem>>, vector<128x1xi32>
    %c128_4 = arith.constant 128 : index
    %c0_5 = arith.constant 0 : index
    %3 = vector.load %arg3[%c128_4, %c0_5] : memref<256x1xi32, #tpu.memory_space<vmem>>, vector<128x1xi32>
    %4 = tpu.iota {dimensions = array<i32: 0>} : vector<128x128xi32>
    %5 = vector.broadcast %0 : vector<1x128xi32> to vector<128x128xi32>
    %6 = arith.cmpi eq, %4, %5 : vector<128x128xi32>
    %7 = arith.extui %6 : vector<128x128xi1> to vector<128x128xi32>
    %8 = arith.sitofp %7 : vector<128x128xi32> to vector<128x128xf32>
    %9 = arith.truncf %8 : vector<128x128xf32> to vector<128x128xbf16>
    %10 = tpu.iota {dimensions = array<i32: 1>} : vector<128x128xi32>
    %11 = vector.broadcast %2 : vector<128x1xi32> to vector<128x128xi32>
    %12 = arith.cmpi eq, %10, %11 : vector<128x128xi32>
    %13 = arith.extui %12 : vector<128x128xi1> to vector<128x128xi32>
    %14 = arith.sitofp %13 : vector<128x128xi32> to vector<128x128xf32>
    %15 = arith.truncf %14 : vector<128x128xf32> to vector<128x128xbf16>
    %16 = tpu.iota {dimensions = array<i32: 0>} : vector<128x128xi32>
    %17 = vector.broadcast %1 : vector<1x128xi32> to vector<128x128xi32>
    %18 = arith.cmpi eq, %16, %17 : vector<128x128xi32>
    %19 = arith.extui %18 : vector<128x128xi1> to vector<128x128xi32>
    %20 = arith.sitofp %19 : vector<128x128xi32> to vector<128x128xf32>
    %21 = arith.truncf %20 : vector<128x128xf32> to vector<128x128xbf16>
    %22 = tpu.iota {dimensions = array<i32: 1>} : vector<128x128xi32>
    %23 = vector.broadcast %3 : vector<128x1xi32> to vector<128x128xi32>
    %24 = arith.cmpi eq, %22, %23 : vector<128x128xi32>
    %25 = arith.extui %24 : vector<128x128xi1> to vector<128x128xi32>
    %26 = arith.sitofp %25 : vector<128x128xi32> to vector<128x128xf32>
    %27 = arith.truncf %26 : vector<128x128xf32> to vector<128x128xbf16>
    %c0_6 = arith.constant 0 : index
    %c0_7 = arith.constant 0 : index
    %28 = vector.load %arg4[%c0_6, %c0_7] : memref<520x64xbf16, #tpu.memory_space<vmem>>, vector<32x8xbf16>
    %c0_8 = arith.constant 0 : index
    %c0_9 = arith.constant 0 : index
    %29 = vector.load %arg0[%c0_8, %c0_9] : memref<8x128xbf16, #tpu.memory_space<vmem>>, vector<8x128xbf16>
    %cst = arith.constant dense<0.000000e+00> : vector<32x128xf32>
    %30 = tpu.matmul %28, %29, %cst {dimension_numbers = #tpu.dot_dimension_numbers<[1], [0], [0], [1], [0, 0, 1, 1], [], []>} : vector<32x8xbf16>, vector<8x128xbf16>, vector<32x128xf32> -> vector<32x128xf32>
    %c0_10 = arith.constant 0 : index
    %c0_11 = arith.constant 0 : index
    %31 = vector.load %arg5[%c0_10, %c0_11] : memref<392x1xf32, #tpu.memory_space<vmem>>, vector<32x1xf32>
    %32 = vector.broadcast %31 : vector<32x1xf32> to vector<32x128xf32>
    %33 = arith.addf %30, %32 : vector<32x128xf32>
    %c32 = arith.constant 32 : index
    %c0_12 = arith.constant 0 : index
    %34 = vector.load %arg4[%c32, %c0_12] : memref<520x64xbf16, #tpu.memory_space<vmem>>, vector<64x8xbf16>
    %c0_13 = arith.constant 0 : index
    %c0_14 = arith.constant 0 : index
    %35 = vector.load %arg1[%c0_13, %c0_14] : memref<8x128xbf16, #tpu.memory_space<vmem>>, vector<8x128xbf16>
    %cst_15 = arith.constant dense<0.000000e+00> : vector<64x128xf32>
    %36 = tpu.matmul %34, %35, %cst_15 {dimension_numbers = #tpu.dot_dimension_numbers<[1], [0], [0], [1], [0, 0, 1, 1], [], []>} : vector<64x8xbf16>, vector<8x128xbf16>, vector<64x128xf32> -> vector<64x128xf32>
    %c32_16 = arith.constant 32 : index
    %c0_17 = arith.constant 0 : index
    %37 = vector.load %arg5[%c32_16, %c0_17] : memref<392x1xf32, #tpu.memory_space<vmem>>, vector<64x1xf32>
    %38 = vector.broadcast %37 : vector<64x1xf32> to vector<64x128xf32>
    %39 = arith.addf %36, %38 : vector<64x128xf32>
    %cst_18 = arith.constant 0.000000e+00 : f32
    %40 = vector.broadcast %cst_18 : f32 to vector<32x128xf32>
    %41 = arith.truncf %40 : vector<32x128xf32> to vector<32x128xbf16>
    %cst_19 = arith.constant dense<0.000000e+00> : vector<32x128xf32>
    %42 = tpu.matmul %41, %21, %cst_19 {dimension_numbers = #tpu.dot_dimension_numbers<[1], [0], [0], [1], [0, 0, 1, 1], [], []>} : vector<32x128xbf16>, vector<128x128xbf16>, vector<32x128xf32> -> vector<32x128xf32>
    %43 = arith.addf %33, %42 : vector<32x128xf32>
    %44 = arith.truncf %43 : vector<32x128xf32> to vector<32x128xbf16>
    %cst_20 = arith.constant dense<0.000000e+00> : vector<32x128xf32>
    %45 = tpu.matmul %44, %9, %cst_20 {dimension_numbers = #tpu.dot_dimension_numbers<[1], [0], [0], [1], [0, 0, 1, 1], [], []>} : vector<32x128xbf16>, vector<128x128xbf16>, vector<32x128xf32> -> vector<32x128xf32>
    %46 = vector.extract_strided_slice %39 {offsets = [0, 0], sizes = [32, 128], strides = [1, 1]} : vector<64x128xf32> to vector<32x128xf32>
    %47 = arith.addf %46, %45 : vector<32x128xf32>
    %cst_21 = arith.constant 0.000000e+00 : f32
    %48 = vector.broadcast %cst_21 : f32 to vector<32x128xf32>
    %49 = arith.maximumf %47, %48 : vector<32x128xf32>
    %50 = arith.truncf %49 : vector<32x128xf32> to vector<32x128xbf16>
    %cst_22 = arith.constant dense<0.000000e+00> : vector<32x128xf32>
    %51 = tpu.matmul %50, %15, %cst_22 {dimension_numbers = #tpu.dot_dimension_numbers<[1], [0], [0], [1], [0, 0, 1, 1], [], []>} : vector<32x128xbf16>, vector<128x128xbf16>, vector<32x128xf32> -> vector<32x128xf32>
    %c96 = arith.constant 96 : index
    %c0_23 = arith.constant 0 : index
    %52 = vector.load %arg4[%c96, %c0_23] : memref<520x64xbf16, #tpu.memory_space<vmem>>, vector<32x32xbf16>
    %53 = arith.addf %43, %51 : vector<32x128xf32>
    %54 = arith.truncf %53 : vector<32x128xf32> to vector<32x128xbf16>
    %cst_24 = arith.constant dense<0.000000e+00> : vector<32x128xf32>
    %55 = tpu.matmul %52, %54, %cst_24 {dimension_numbers = #tpu.dot_dimension_numbers<[1], [0], [0], [1], [0, 0, 1, 1], [], []>} : vector<32x32xbf16>, vector<32x128xbf16>, vector<32x128xf32> -> vector<32x128xf32>
    %c96_25 = arith.constant 96 : index
    %c0_26 = arith.constant 0 : index
    %56 = vector.load %arg5[%c96_25, %c0_26] : memref<392x1xf32, #tpu.memory_space<vmem>>, vector<32x1xf32>
    %57 = vector.broadcast %56 : vector<32x1xf32> to vector<32x128xf32>
    %58 = arith.addf %55, %57 : vector<32x128xf32>
    %cst_27 = arith.constant 0.000000e+00 : f32
    %59 = vector.broadcast %cst_27 : f32 to vector<32x128xf32>
    %60 = arith.maximumf %58, %59 : vector<32x128xf32>
    %61 = arith.truncf %60 : vector<32x128xf32> to vector<32x128xbf16>
    %c160 = arith.constant 160 : index
    %c0_28 = arith.constant 0 : index
    %62 = vector.load %arg4[%c160, %c0_28] : memref<520x64xbf16, #tpu.memory_space<vmem>>, vector<64x32xbf16>
    %63 = arith.truncf %42 : vector<32x128xf32> to vector<32x128xbf16>
    %cst_29 = arith.constant dense<0.000000e+00> : vector<64x128xf32>
    %64 = tpu.matmul %62, %63, %cst_29 {dimension_numbers = #tpu.dot_dimension_numbers<[1], [0], [0], [1], [0, 0, 1, 1], [], []>} : vector<64x32xbf16>, vector<32x128xbf16>, vector<64x128xf32> -> vector<64x128xf32>
    %c288 = arith.constant 288 : index
    %c0_30 = arith.constant 0 : index
    %65 = vector.load %arg4[%c288, %c0_30] : memref<520x64xbf16, #tpu.memory_space<vmem>>, vector<64x32xbf16>
    %cst_31 = arith.constant dense<0.000000e+00> : vector<64x128xf32>
    %66 = tpu.matmul %65, %61, %cst_31 {dimension_numbers = #tpu.dot_dimension_numbers<[1], [0], [0], [1], [0, 0, 1, 1], [], []>} : vector<64x32xbf16>, vector<32x128xbf16>, vector<64x128xf32> -> vector<64x128xf32>
    %67 = arith.addf %64, %66 : vector<64x128xf32>
    %c160_32 = arith.constant 160 : index
    %c0_33 = arith.constant 0 : index
    %68 = vector.load %arg5[%c160_32, %c0_33] : memref<392x1xf32, #tpu.memory_space<vmem>>, vector<64x1xf32>
    %69 = vector.broadcast %68 : vector<64x1xf32> to vector<64x128xf32>
    %70 = arith.addf %67, %69 : vector<64x128xf32>
    %cst_34 = arith.constant 0.000000e+00 : f32
    %71 = vector.broadcast %cst_34 : f32 to vector<64x128xf32>
    %72 = arith.maximumf %70, %71 : vector<64x128xf32>
    %73 = arith.truncf %72 : vector<64x128xf32> to vector<64x128xbf16>
    %cst_35 = arith.constant dense<0.000000e+00> : vector<64x128xf32>
    %74 = tpu.matmul %73, %27, %cst_35 {dimension_numbers = #tpu.dot_dimension_numbers<[1], [0], [0], [1], [0, 0, 1, 1], [], []>} : vector<64x128xbf16>, vector<128x128xbf16>, vector<64x128xf32> -> vector<64x128xf32>
    %c416 = arith.constant 416 : index
    %c0_36 = arith.constant 0 : index
    %75 = vector.load %arg4[%c416, %c0_36] : memref<520x64xbf16, #tpu.memory_space<vmem>>, vector<32x64xbf16>
    %76 = arith.truncf %74 : vector<64x128xf32> to vector<64x128xbf16>
    %cst_37 = arith.constant dense<0.000000e+00> : vector<32x128xf32>
    %77 = tpu.matmul %75, %76, %cst_37 {dimension_numbers = #tpu.dot_dimension_numbers<[1], [0], [0], [1], [0, 0, 1, 1], [], []>} : vector<32x64xbf16>, vector<64x128xbf16>, vector<32x128xf32> -> vector<32x128xf32>
    %c288_38 = arith.constant 288 : index
    %c0_39 = arith.constant 0 : index
    %78 = vector.load %arg5[%c288_38, %c0_39] : memref<392x1xf32, #tpu.memory_space<vmem>>, vector<32x1xf32>
    %79 = vector.broadcast %78 : vector<32x1xf32> to vector<32x128xf32>
    %80 = arith.addf %77, %79 : vector<32x128xf32>
    %cst_40 = arith.constant 0.000000e+00 : f32
    %81 = vector.broadcast %cst_40 : f32 to vector<32x128xf32>
    %82 = arith.maximumf %80, %81 : vector<32x128xf32>
    %83 = arith.truncf %82 : vector<32x128xf32> to vector<32x128xbf16>
    %cst_41 = arith.constant dense<0.000000e+00> : vector<32x128xf32>
    %84 = tpu.matmul %83, %21, %cst_41 {dimension_numbers = #tpu.dot_dimension_numbers<[1], [0], [0], [1], [0, 0, 1, 1], [], []>} : vector<32x128xbf16>, vector<128x128xbf16>, vector<32x128xf32> -> vector<32x128xf32>
    %85 = arith.addf %60, %84 : vector<32x128xf32>
    %86 = arith.truncf %85 : vector<32x128xf32> to vector<32x128xbf16>
    %cst_42 = arith.constant dense<0.000000e+00> : vector<32x128xf32>
    %87 = tpu.matmul %86, %9, %cst_42 {dimension_numbers = #tpu.dot_dimension_numbers<[1], [0], [0], [1], [0, 0, 1, 1], [], []>} : vector<32x128xbf16>, vector<128x128xbf16>, vector<32x128xf32> -> vector<32x128xf32>
    %88 = vector.extract_strided_slice %39 {offsets = [32, 0], sizes = [32, 128], strides = [1, 1]} : vector<64x128xf32> to vector<32x128xf32>
    %89 = arith.addf %88, %87 : vector<32x128xf32>
    %cst_43 = arith.constant 0.000000e+00 : f32
    %90 = vector.broadcast %cst_43 : f32 to vector<32x128xf32>
    %91 = arith.maximumf %89, %90 : vector<32x128xf32>
    %92 = arith.truncf %91 : vector<32x128xf32> to vector<32x128xbf16>
    %cst_44 = arith.constant dense<0.000000e+00> : vector<32x128xf32>
    %93 = tpu.matmul %92, %15, %cst_44 {dimension_numbers = #tpu.dot_dimension_numbers<[1], [0], [0], [1], [0, 0, 1, 1], [], []>} : vector<32x128xbf16>, vector<128x128xbf16>, vector<32x128xf32> -> vector<32x128xf32>
    %c128_45 = arith.constant 128 : index
    %c0_46 = arith.constant 0 : index
    %94 = vector.load %arg4[%c128_45, %c0_46] : memref<520x64xbf16, #tpu.memory_space<vmem>>, vector<32x32xbf16>
    %95 = arith.addf %85, %93 : vector<32x128xf32>
    %96 = arith.truncf %95 : vector<32x128xf32> to vector<32x128xbf16>
    %cst_47 = arith.constant dense<0.000000e+00> : vector<32x128xf32>
    %97 = tpu.matmul %94, %96, %cst_47 {dimension_numbers = #tpu.dot_dimension_numbers<[1], [0], [0], [1], [0, 0, 1, 1], [], []>} : vector<32x32xbf16>, vector<32x128xbf16>, vector<32x128xf32> -> vector<32x128xf32>
    %c128_48 = arith.constant 128 : index
    %c0_49 = arith.constant 0 : index
    %98 = vector.load %arg5[%c128_48, %c0_49] : memref<392x1xf32, #tpu.memory_space<vmem>>, vector<32x1xf32>
    %99 = vector.broadcast %98 : vector<32x1xf32> to vector<32x128xf32>
    %100 = arith.addf %97, %99 : vector<32x128xf32>
    %cst_50 = arith.constant 0.000000e+00 : f32
    %101 = vector.broadcast %cst_50 : f32 to vector<32x128xf32>
    %102 = arith.maximumf %100, %101 : vector<32x128xf32>
    %103 = arith.truncf %102 : vector<32x128xf32> to vector<32x128xbf16>
    %c224 = arith.constant 224 : index
    %c0_51 = arith.constant 0 : index
    %104 = vector.load %arg4[%c224, %c0_51] : memref<520x64xbf16, #tpu.memory_space<vmem>>, vector<64x32xbf16>
    %105 = arith.truncf %84 : vector<32x128xf32> to vector<32x128xbf16>
    %cst_52 = arith.constant dense<0.000000e+00> : vector<64x128xf32>
    %106 = tpu.matmul %104, %105, %cst_52 {dimension_numbers = #tpu.dot_dimension_numbers<[1], [0], [0], [1], [0, 0, 1, 1], [], []>} : vector<64x32xbf16>, vector<32x128xbf16>, vector<64x128xf32> -> vector<64x128xf32>
    %c352 = arith.constant 352 : index
    %c0_53 = arith.constant 0 : index
    %107 = vector.load %arg4[%c352, %c0_53] : memref<520x64xbf16, #tpu.memory_space<vmem>>, vector<64x32xbf16>
    %cst_54 = arith.constant dense<0.000000e+00> : vector<64x128xf32>
    %108 = tpu.matmul %107, %103, %cst_54 {dimension_numbers = #tpu.dot_dimension_numbers<[1], [0], [0], [1], [0, 0, 1, 1], [], []>} : vector<64x32xbf16>, vector<32x128xbf16>, vector<64x128xf32> -> vector<64x128xf32>
    %109 = arith.addf %106, %108 : vector<64x128xf32>
    %c224_55 = arith.constant 224 : index
    %c0_56 = arith.constant 0 : index
    %110 = vector.load %arg5[%c224_55, %c0_56] : memref<392x1xf32, #tpu.memory_space<vmem>>, vector<64x1xf32>
    %111 = vector.broadcast %110 : vector<64x1xf32> to vector<64x128xf32>
    %112 = arith.addf %109, %111 : vector<64x128xf32>
    %cst_57 = arith.constant 0.000000e+00 : f32
    %113 = vector.broadcast %cst_57 : f32 to vector<64x128xf32>
    %114 = arith.maximumf %112, %113 : vector<64x128xf32>
    %115 = arith.truncf %114 : vector<64x128xf32> to vector<64x128xbf16>
    %cst_58 = arith.constant dense<0.000000e+00> : vector<64x128xf32>
    %116 = tpu.matmul %115, %27, %cst_58 {dimension_numbers = #tpu.dot_dimension_numbers<[1], [0], [0], [1], [0, 0, 1, 1], [], []>} : vector<64x128xbf16>, vector<128x128xbf16>, vector<64x128xf32> -> vector<64x128xf32>
    %c448 = arith.constant 448 : index
    %c0_59 = arith.constant 0 : index
    %117 = vector.load %arg4[%c448, %c0_59] : memref<520x64xbf16, #tpu.memory_space<vmem>>, vector<32x64xbf16>
    %118 = arith.truncf %116 : vector<64x128xf32> to vector<64x128xbf16>
    %cst_60 = arith.constant dense<0.000000e+00> : vector<32x128xf32>
    %119 = tpu.matmul %117, %118, %cst_60 {dimension_numbers = #tpu.dot_dimension_numbers<[1], [0], [0], [1], [0, 0, 1, 1], [], []>} : vector<32x64xbf16>, vector<64x128xbf16>, vector<32x128xf32> -> vector<32x128xf32>
    %c320 = arith.constant 320 : index
    %c0_61 = arith.constant 0 : index
    %120 = vector.load %arg5[%c320, %c0_61] : memref<392x1xf32, #tpu.memory_space<vmem>>, vector<32x1xf32>
    %121 = vector.broadcast %120 : vector<32x1xf32> to vector<32x128xf32>
    %122 = arith.addf %119, %121 : vector<32x128xf32>
    %cst_62 = arith.constant 0.000000e+00 : f32
    %123 = vector.broadcast %cst_62 : f32 to vector<32x128xf32>
    %124 = arith.maximumf %122, %123 : vector<32x128xf32>
    %c480 = arith.constant 480 : index
    %c0_63 = arith.constant 0 : index
    %125 = vector.load %arg4[%c480, %c0_63] : memref<520x64xbf16, #tpu.memory_space<vmem>>, vector<32x32xbf16>
    %126 = arith.truncf %124 : vector<32x128xf32> to vector<32x128xbf16>
    %cst_64 = arith.constant dense<0.000000e+00> : vector<32x128xf32>
    %127 = tpu.matmul %125, %126, %cst_64 {dimension_numbers = #tpu.dot_dimension_numbers<[1], [0], [0], [1], [0, 0, 1, 1], [], []>} : vector<32x32xbf16>, vector<32x128xbf16>, vector<32x128xf32> -> vector<32x128xf32>
    %c352_65 = arith.constant 352 : index
    %c0_66 = arith.constant 0 : index
    %128 = vector.load %arg5[%c352_65, %c0_66] : memref<392x1xf32, #tpu.memory_space<vmem>>, vector<32x1xf32>
    %129 = vector.broadcast %128 : vector<32x1xf32> to vector<32x128xf32>
    %130 = arith.addf %127, %129 : vector<32x128xf32>
    %cst_67 = arith.constant 0.000000e+00 : f32
    %131 = vector.broadcast %cst_67 : f32 to vector<32x128xf32>
    %132 = arith.maximumf %130, %131 : vector<32x128xf32>
    %c512 = arith.constant 512 : index
    %c0_68 = arith.constant 0 : index
    %133 = vector.load %arg4[%c512, %c0_68] : memref<520x64xbf16, #tpu.memory_space<vmem>>, vector<8x32xbf16>
    %134 = arith.truncf %132 : vector<32x128xf32> to vector<32x128xbf16>
    %cst_69 = arith.constant dense<0.000000e+00> : vector<8x128xf32>
    %135 = tpu.matmul %133, %134, %cst_69 {dimension_numbers = #tpu.dot_dimension_numbers<[1], [0], [0], [1], [0, 0, 1, 1], [], []>} : vector<8x32xbf16>, vector<32x128xbf16>, vector<8x128xf32> -> vector<8x128xf32>
    %c384 = arith.constant 384 : index
    %c0_70 = arith.constant 0 : index
    %136 = vector.load %arg5[%c384, %c0_70] : memref<392x1xf32, #tpu.memory_space<vmem>>, vector<8x1xf32>
    %137 = vector.broadcast %136 : vector<8x1xf32> to vector<8x128xf32>
    %138 = arith.addf %135, %137 : vector<8x128xf32>
    %c0_71 = arith.constant 0 : index
    %c0_72 = arith.constant 0 : index
    %139 = vector.load %arg6[%c0_71, %c0_72] : memref<8x128xf32, #tpu.memory_space<vmem>>, vector<8x128xf32>
    tpu.vector_store %arg6[%c0_71, %c0_72], %138 {strides = array<i32>} : memref<8x128xf32, #tpu.memory_space<vmem>>, vector<8x128xf32>,
    return
  }
}

</mosaic_0001>

<bundles_post_ra>
// kernel: expc_forward.1
= control target key start
LH: loop header
LB: loop body
LE: loop exit
PB: predicated region body
PF: predicated region fallthrough
CT: control target
= control target key end

     0   :  { %vm451_vm0 = vcmask 1043456   ;;  %v58_v0 = vlaneseq  ;;  %v3011_v1 = vmov 0   ;;  %vm4208_vm1 = vcmask 64512   ;;  %s4201_s5 = inlined_call_operand.vmem [shape: f32[392,1], index: 5, kind: input, shape index: {}]   ;;  %s4202_s0 = inlined_call_operand.vmem [shape: bf16[8,128], index: 0, kind: input, shape index: {}]   ;;  %s4203_s4 = inlined_call_operand.vmem [shape: bf16[520,64], index: 4, kind: input, shape index: {}]   ;;  %s4204_s2 = inlined_call_operand.vmem [shape: s32[1,256], index: 2, kind: input, shape index: {}]   ;;  %s4205_s3 = inlined_call_operand.vmem [shape: s32[256,1], index: 3, kind: input, shape index: {}]   ;;  %s4206_s1 = inlined_call_operand.vmem [shape: bf16[8,128], index: 1, kind: input, shape index: {}]   ;;  %s4207_s6 = inlined_call_operand.vmem [shape: f32[8,128], index: 6, kind: output, shape index: {}]  }
   0x1   :  { %2978 = vset.pattern.permute.xlu1 %v3011_v1  ;;  %2977 = vset.pattern.permute.xlu0 %v3011_v1  ;;  %v412_v2 = vld [vmem:[%s4201_s5 + $0x10] sm:$0xff]  ;;  %v410_v3 = vld [vmem:[%s4201_s5] sm:$0xff]  ;;  %v413_v7 = vld [vmem:[%s4201_s5 + $0x18] sm:$0xff]  ;;  %v3012_v20 = vmov 1.0|1.0   ;;  %v4253_v21 = vmov 0 }
   0x2   :  { %v409_v4 = vld [vmem:[%s4202_s0] sm:$0xf]  ;;  %426 = vperm.xlu1 %2978, %v412_v2   ;;  %416 = vperm.xlu0 %2977, %v410_v3   ;;  %v411_v8 = vld [vmem:[%s4201_s5 + $0x8] sm:$0xff]  ;;  %v3073_v9 = vshrl.u32 %v58_v0, 7  ;;  %v29_v24 = vld [vmem:[%s4205_s3 + $0x18] sm:$0xff]  ;;  %v4255_v26 = vmov 0 }
   0x3   :  { %v453_v5 = vsel %vm451_vm0, %v409_v4, 0  ;;  %v2979_v6 = vld [vmem:[%s4203_s4] sm:$0xff]   ;;  %2971 = vmatprep.subr.msk.bf16.mxu0 %vm451_vm0, %v409_v4  ;;  %v2980_v10 = vld [vmem:[%s4203_s4 + $0x8] sm:$0xff]   ;;  %v28_v25 = vld [vmem:[%s4205_s3 + $0x10] sm:$0xff]  ;;  %v4257_v31 = vmov 0  ;;  %v4259_v36 = vmov 0 }
   0x4   :  { %2652 = vmatpush3.bf16.msra.mxu0 %v453_v5  ;;  %2653 = vmatprep.mubr.msk.bf16.mxu0 %vm4208_vm1, %v2979_v6  ;;  %v3082_v11 = vld [vmem:[%s4204_s2 + $0x1] ss:$0 sm:$0xff]  ;;  %v3085_v12 = vadd.s32 8, %v3073_v9  ;;  %v3090_v13 = vadd.s32 16, %v3073_v9  ;;  %v3093_v14 = vadd.s32 24, %v3073_v9  ;;  %v3096_v15 = vadd.s32 32, %v3073_v9 }
   0x5   :  { %vm245_vm2 = vcmp.eq.s32.totalorder %v3073_v9, %v3082_v11  ;;  %v3099_v16 = vadd.s32 40, %v3073_v9  ;;  %v27_v17 = vld [vmem:[%s4205_s3 + $0x8] sm:$0xff]  ;;  %v26_v19 = vld [vmem:[%s4205_s3] sm:$0xff]  ;;  %v3131_v22 = vadd.s32 48, %v3073_v9  ;;  %v3134_v23 = vadd.s32 56, %v3073_v9  ;;  %v33_v34 = vld [vmem:[%s4205_s3 + $0x38] sm:$0xff] }
   0x6   :  { %431 = vperm.xlu1 %2978, %v413_v7   ;;  %421 = vperm.xlu0 %2977, %v411_v8   ;;  %vm246_vm3 = vcmp.eq.s32.totalorder %v3085_v12, %v3082_v11  ;;  %vm247_vm4 = vcmp.eq.s32.totalorder %v3090_v13, %v3082_v11  ;;  %vm248_vm5 = vcmp.eq.s32.totalorder %v3093_v14, %v3082_v11  ;;  %v3157_v27 = vadd.s32 64, %v3073_v9  ;;  %v31_v29 = vld [vmem:[%s4205_s3 + $0x28] sm:$0xff]  ;;  %v30_v30 = vld [vmem:[%s4205_s3 + $0x20] sm:$0xff]  ;;  %v32_v35 = vld [vmem:[%s4205_s3 + $0x30] sm:$0xff] }
   0x7   :  { %2654 = vmatmul.mubr.msk.bf16.vlgmr.msra.gmra.mrb[0].mxu0 %vm4208_vm1, %v2980_v10  ;;  %vm3111_vm6 = vmpackc.low %vm246_vm3, %vm245_vm2  ;;  %vm249_vm8 = vcmp.eq.s32.totalorder %v3096_v15, %v3082_v11  ;;  %vm250_vm9 = vcmp.eq.s32.totalorder %v3099_v16, %v3082_v11  ;;  %vm251_vm11 = vcmp.eq.s32.totalorder %v3131_v22, %v3082_v11  ;;  %vm252_vm12 = vcmp.eq.s32.totalorder %v3134_v23, %v3082_v11  ;;  %v35_v39 = vld [vmem:[%s4205_s3 + $0x48] sm:$0xff]  ;;  %v34_v40 = vld [vmem:[%s4205_s3 + $0x40] sm:$0xff] }
   0x8   :  { %2683 = vmatprep.mubr.bf16.mxu0 %v3011_v1  ;;  %2667 = vmatprep.subr.msk.bf16.mxu0 %vm3111_vm6, %v3012_v20  ;;  %vm3122_vm7 = vmpackc.low %vm248_vm5, %vm247_vm4  ;;  %v3160_v28 = vadd.s32 72, %v3073_v9  ;;  %vm253_vm14 = vcmp.eq.s32.totalorder %v3157_v27, %v3082_v11  ;;  %v3183_v32 = vadd.s32 80, %v3073_v9  ;;  %v3186_v33 = vadd.s32 88, %v3073_v9  ;;  %v37_v44 = vld [vmem:[%s4205_s3 + $0x58] sm:$0xff]  ;;  %v36_v45 = vld [vmem:[%s4205_s3 + $0x50] sm:$0xff] }
   0x9   :  { %v4254_v21 = vsel %vm3122_vm7, 4294967295, %v4253_v21  ;;  %2668 = vmatpush3.bf16.msk.msra.mxu0 %vm3111_vm6, %v3012_v20  ;;  %vm3148_vm10 = vmpackc.low %vm250_vm9, %vm249_vm8  ;;  %v3209_v37 = vadd.s32 96, %v3073_v9  ;;  %v3212_v38 = vadd.s32 104, %v3073_v9  ;;  %v4261_v41 = vmov 0  ;;  %v39_v47 = vld [vmem:[%s4205_s3 + $0x68] sm:$0xff]  ;;  %v38_v48 = vld [vmem:[%s4205_s3 + $0x60] sm:$0xff] }
   0xa   :  { %141 = vperm.xlu1 %2978, %v27_v17   ;;  %138 = vperm.xlu0 %2977, %v26_v19   ;;  %v4256_v26 = vsel %vm3148_vm10, 4294967295, %v4255_v26  ;;  %vm3174_vm13 = vmpackc.low %vm252_vm12, %vm251_vm11  ;;  %vm254_vm15 = vcmp.eq.s32.totalorder %v3160_v28, %v3082_v11  ;;  %vm255_vm3 = vcmp.eq.s32.totalorder %v3183_v32, %v3082_v11  ;;  %vm256_vm4 = vcmp.eq.s32.totalorder %v3186_v33, %v3082_v11  ;;  %v514_v50 = vld [vmem:[%s4201_s5 + $0x28] sm:$0xff]  ;;  %v513_v51 = vld [vmem:[%s4201_s5 + $0x20] sm:$0xff] }
   0xb   :  { %2669 = vmatprep.subr.msk.bf16.mxu0 %vm3122_vm7, %v3012_v20  ;;  %v4258_v31 = vsel %vm3174_vm13, 4294967295, %v4257_v31  ;;  %vm3200_vm2 = vmpackc.low %vm254_vm15, %vm253_vm14  ;;  %vm257_vm8 = vcmp.eq.s32.totalorder %v3209_v37, %v3082_v11  ;;  %vm258_vm9 = vcmp.eq.s32.totalorder %v3212_v38, %v3082_v11  ;;  %v3235_v42 = vadd.s32 112, %v3073_v9  ;;  %v41_v52 = vld [vmem:[%s4205_s3 + $0x78] sm:$0xff]  ;;  %v40_v53 = vld [vmem:[%s4205_s3 + $0x70] sm:$0xff] }
   0xc   :  { %v4260_v36 = vsel %vm3200_vm2, 4294967295, %v4259_v36  ;;  %vm3226_vm5 = vmpackc.low %vm256_vm4, %vm255_vm3  ;;  %v3238_v43 = vadd.s32 120, %v3073_v9  ;;  %v4263_v46 = vmov 0  ;;  %v4265_v49 = vmov 0  ;;  %v516_v54 = vld [vmem:[%s4201_s5 + $0x38] sm:$0xff]  ;;  %v515_v55 = vld [vmem:[%s4201_s5 + $0x30] sm:$0xff] }
   0xd   :  { %2670 = vmatpush3.bf16.msk.msra.mxu0 %vm3122_vm7, %v3012_v20  ;;  %v4262_v41 = vsel %vm3226_vm5, 4294967295, %v4261_v41  ;;  %vm3252_vm11 = vmpackc.low %vm258_vm9, %vm257_vm8  ;;  %vm259_vm12 = vcmp.eq.s32.totalorder %v3235_v42, %v3082_v11  ;;  %v835_v56 = vld [vmem:[%s4201_s5 + $0x68] sm:$0xff]  ;;  %v834_v57 = vld [vmem:[%s4201_s5 + $0x60] sm:$0xff] }
   0xe   :  { %147 = vperm.xlu1 %2978, %v29_v24   ;;  %144 = vperm.xlu0 %2977, %v28_v25   ;;  %v4264_v46 = vsel %vm3252_vm11, 4294967295, %v4263_v46  ;;  %vm260_vm14 = vcmp.eq.s32.totalorder %v3238_v43, %v3082_v11  ;;  %v837_v58 = vld [vmem:[%s4201_s5 + $0x78] sm:$0xff]  ;;  %v836_v59 = vld [vmem:[%s4201_s5 + $0x70] sm:$0xff]  ;;  %v43_v60 = vld [vmem:[%s4205_s3 + $0x88] sm:$0xff] }
   0xf   :  { %2671 = vmatprep.subr.msk.bf16.mxu0 %vm3148_vm10, %v3012_v20  ;;  %vm3272_vm15 = vmpackc.low %vm260_vm14, %vm259_vm12  ;;  %v42_v61 = vld [vmem:[%s4205_s3 + $0x80] sm:$0xff]  ;;  %v45_v62 = vld [vmem:[%s4205_s3 + $0x98] sm:$0xff] }
  0x10   :  { %v4266_v49 = vsel %vm3272_vm15, 4294967295, %v4265_v49  ;;  %v44_v63 = vld [vmem:[%s4205_s3 + $0x90] sm:$0xff]  ;;  %v46_v2 = vld [vmem:[%s4205_s3 + $0xa0] sm:$0xff]  ;;  %v49_v3 = vld [vmem:[%s4205_s3 + $0xb8] sm:$0xff] }
  0x11   :  { %2672 = vmatpush3.bf16.msk.msra.mxu0 %vm3148_vm10, %v3012_v20  ;;  %v48_v4 = vld [vmem:[%s4205_s3 + $0xb0] sm:$0xff]  ;;  %v51_v5 = vld [vmem:[%s4205_s3 + $0xc8] sm:$0xff]  ;;  %v50_v6 = vld [vmem:[%s4205_s3 + $0xc0] sm:$0xff] }
  0x12   :  { %153 = vperm.xlu1 %2978, %v31_v29   ;;  %150 = vperm.xlu0 %2977, %v30_v30   ;;  %v53_v7 = vld [vmem:[%s4205_s3 + $0xd8] sm:$0xff]  ;;  %v52_v8 = vld [vmem:[%s4205_s3 + $0xd0] sm:$0xff]  ;;  %v55_v10 = vld [vmem:[%s4205_s3 + $0xe8] sm:$0xff] }
  0x13   :  { %2673 = vmatprep.subr.msk.bf16.mxu0 %vm3174_vm13, %v3012_v20  ;;  %v54_v11 = vld [vmem:[%s4205_s3 + $0xe0] sm:$0xff]  ;;  %v1143_v17 = vld [vmem:[%s4201_s5 + $0xa8] sm:$0xff]  ;;  %v57_v24 = vld [vmem:[%s4205_s3 + $0xf8] sm:$0xff] }
  0x14   :  { %v1142_v19 = vld [vmem:[%s4201_s5 + $0xa0] sm:$0xff]  ;;  %v56_v25 = vld [vmem:[%s4205_s3 + $0xf0] sm:$0xff]  ;;  %v1145_v29 = vld [vmem:[%s4201_s5 + $0xb8] sm:$0xff] }
  0x15   :  { %2674 = vmatpush3.bf16.msk.msra.mxu0 %vm3174_vm13, %v3012_v20  ;;  %v1144_v30 = vld [vmem:[%s4201_s5 + $0xb0] sm:$0xff] }
  0x16   :  { %159 = vperm.xlu1 %2978, %v33_v34   ;;  %156 = vperm.xlu0 %2977, %v32_v35   ;;  %v1147_v34 = vld [vmem:[%s4201_s5 + $0xc8] sm:$0xff]  ;;  %v512_v35 = vld [vmem:[%s4206_s1] sm:$0xf] }
  0x17   :  { %2675 = vmatprep.subr.msk.bf16.mxu0 %vm3200_vm2, %v3012_v20  ;;  %2972 = vmatprep.subr.msk.bf16.mxu1 %vm451_vm0, %v512_v35 }
  0x19   :  { %2676 = vmatpush3.bf16.msk.msra.mxu0 %vm3200_vm2, %v3012_v20 }
  0x1a   :  { %165 = vperm.xlu1 %2978, %v35_v39   ;;  %162 = vperm.xlu0 %2977, %v34_v40   ;;  %v1146_v39 = vld [vmem:[%s4201_s5 + $0xc0] sm:$0xff]  ;;  %v594_v40 = vsel %vm451_vm0, %v512_v35, 0  ;;  %v2002_v35 = vld [vmem:[%s4201_s5 + $0x150] sm:$0xff] }
  0x1b   :  { %2677 = vmatprep.subr.msk.bf16.mxu0 %vm3226_vm5, %v3012_v20  ;;  %2658 = vmatpush3.bf16.msra.mxu1 %v594_v40 }
  0x1d   :  { %2678 = vmatpush3.bf16.msk.msra.mxu0 %vm3226_vm5, %v3012_v20 }
  0x1e   :  { %171 = vperm.xlu1 %2978, %v37_v44   ;;  %168 = vperm.xlu0 %2977, %v36_v45   ;;  %v2981_v44 = vld [vmem:[%s4203_s4 + $0x10] sm:$0xff]   ;;  %v3393_v45 = vld [vmem:[%s4204_s2] ss:$0 sm:$0xff] }
  0x1f   :  { %2679 = vmatprep.subr.msk.bf16.mxu0 %vm3252_vm11, %v3012_v20  ;;  %vm79_vm3 = vcmp.eq.s32.totalorder %v3073_v9, %v3393_v45  ;;  %vm80_vm0 = vcmp.eq.s32.totalorder %v3085_v12, %v3393_v45  ;;  %2659 = vmatprep.mubr.msk.bf16.mxu1 %vm4208_vm1, %v2981_v44  ;;  %vm81_vm8 = vcmp.eq.s32.totalorder %v3090_v13, %v3393_v45  ;;  %v1284_v9 = vld [vmem:[%s4201_s5 + $0x128] sm:$0xff]  ;;  %v4269_v12 = vmov 0  ;;  %v1283_v13 = vld [vmem:[%s4201_s5 + $0x120] sm:$0xff] }
  0x20   :  { %vm3406_vm4 = vmpackc.low %vm80_vm0, %vm79_vm3  ;;  %vm82_vm9 = vcmp.eq.s32.totalorder %v3093_v14, %v3393_v45  ;;  %vm83_vm14 = vcmp.eq.s32.totalorder %v3096_v15, %v3393_v45  ;;  %vm84_vm3 = vcmp.eq.s32.totalorder %v3099_v16, %v3393_v45  ;;  %v1286_v14 = vld [vmem:[%s4201_s5 + $0x138] sm:$0xff]  ;;  %v1285_v15 = vld [vmem:[%s4201_s5 + $0x130] sm:$0xff] }
  0x21   :  { %2680 = vmatpush3.bf16.msk.msra.mxu0 %vm3252_vm11, %v3012_v20  ;;  %2687 = vmatprep.subr.msk.bf16.mxu1 %vm3406_vm4, %v3012_v20  ;;  %vm3427_vm12 = vmpackc.low %vm82_vm9, %vm81_vm8  ;;  %vm85_vm8 = vcmp.eq.s32.totalorder %v3131_v22, %v3393_v45  ;;  %vm86_vm9 = vcmp.eq.s32.totalorder %v3134_v23, %v3393_v45  ;;  %v518_v16 = vld [vmem:[%s4201_s5 + $0x48] sm:$0xff]  ;;  %v517_v22 = vld [vmem:[%s4201_s5 + $0x40] sm:$0xff] }
  0x22   :  { %177 = vperm.xlu1 %2978, %v39_v47   ;;  %174 = vperm.xlu0 %2977, %v38_v48   ;;  %v1149_v47 = vld [vmem:[%s4201_s5 + $0xd8] sm:$0xff]  ;;  %v1148_v48 = vld [vmem:[%s4201_s5 + $0xd0] sm:$0xff]  ;;  %v4270_v12 = vsel %vm3427_vm12, 4294967295, %v4269_v12  ;;  %vm3447_vm0 = vmpackc.low %vm84_vm3, %vm83_vm14  ;;  %vm87_vm3 = vcmp.eq.s32.totalorder %v3157_v27, %v3393_v45 }
  0x23   :  { %2681 = vmatprep.subr.msk.bf16.mxu0 %vm3272_vm15, %v3012_v20  ;;  %vm3467_vm14 = vmpackc.low %vm86_vm9, %vm85_vm8  ;;  %v520_v23 = vld [vmem:[%s4201_s5 + $0x58] sm:$0xff]  ;;  %v519_v27 = vld [vmem:[%s4201_s5 + $0x50] sm:$0xff]  ;;  %vm89_vm9 = vcmp.eq.s32.totalorder %v3183_v32, %v3393_v45 }
  0x24   :  { %v1552_v32 = vld [vmem:[%s4201_s5 + $0x80] sm:$0xff]  ;;  %v2100_v44 = vld [vmem:[%s4201_s5 + $0x168] sm:$0xff] }
  0x25   :  { %2682 = vmatpush3.bf16.msk.msra.mxu0 %vm3272_vm15, %v3012_v20 }
  0x26   :  { %528 = vperm.xlu1 %2978, %v514_v50   ;;  %523 = vperm.xlu0 %2977, %v513_v51   ;;  %v4267_v50 = vmov 0  ;;  %v2982_v51 = vld [vmem:[%s4203_s4 + $0x18] sm:$0xff]  }
  0x27   :  { %v4268_v50 = vsel %vm3406_vm4, 4294967295, %v4267_v50  ;;  %2660 = vmatmul.mubr.msk.bf16.vlgmr.msra.gmra.mrb[0].mxu1 %vm4208_vm1, %v2982_v51  ;;  %vm88_vm1 = vcmp.eq.s32.totalorder %v3160_v28, %v3393_v45  ;;  %v1553_v28 = vld [vmem:[%s4201_s5 + $0x88] sm:$0xff] }
  0x28   :  { %2684 = vmatmul.mubr.bf16.vlgmr.msra.gmra.mrb[4].mxu0 %v3011_v1  ;;  %v47_v1 = vld [vmem:[%s4205_s3 + $0xa8] sm:$0xff]  ;;  %2688 = vmatpush3.bf16.msk.msra.mxu1 %vm3406_vm4, %v3012_v20  ;;  %vm3487_vm8 = vmpackc.low %vm88_vm1, %vm87_vm3  ;;  %vm92_vm3 = vcmp.eq.s32.totalorder %v3212_v38, %v3393_v45  ;;  %v1859_v38 = vld [vmem:[%s4201_s5 + $0xe0] sm:$0xff] }
  0x29   :  { %2689 = vmatprep.subr.msk.bf16.mxu1 %vm3427_vm12, %v3012_v20 }
  0x2a   :  { %183 = vperm.xlu1 %2978, %v41_v52   ;;  %180 = vperm.xlu0 %2977, %v40_v53   ;;  %v4271_v52 = vmov 0  ;;  %v4273_v53 = vmov 0 }
  0x2b   :  { %v4272_v52 = vsel %vm3447_vm0, 4294967295, %v4271_v52  ;;  %v4274_v53 = vsel %vm3467_vm14, 4294967295, %v4273_v53 }
  0x2c   :  { %2690 = vmatpush3.bf16.msk.msra.mxu1 %vm3427_vm12, %v3012_v20 }
  0x2d   :  { %2691 = vmatprep.subr.msk.bf16.mxu1 %vm3447_vm0, %v3012_v20 }
  0x2e   :  { %538 = vperm.xlu1 %2978, %v516_v54   ;;  %533 = vperm.xlu0 %2977, %v515_v55   ;;  %v4275_v54 = vmov 0  ;;  %v4277_v55 = vmov 0 }
  0x2f   :  { %v4276_v54 = vsel %vm3487_vm8, 4294967295, %v4275_v54 }
  0x30   :  { %2692 = vmatpush3.bf16.msk.msra.mxu1 %vm3447_vm0, %v3012_v20  ;;  %vm90_vm0 = vcmp.eq.s32.totalorder %v3186_v33, %v3393_v45  ;;  %v2983_v33 = vld [vmem:[%s4203_s4 + $0x20] sm:$0xff]  }
  0x31   :  { %2693 = vmatprep.subr.msk.bf16.mxu1 %vm3467_vm14, %v3012_v20  ;;  %vm3507_vm1 = vmpackc.low %vm90_vm0, %vm89_vm9  ;;  %vm91_vm0 = vcmp.eq.s32.totalorder %v3209_v37, %v3393_v45  ;;  %vm4279_vm9 = vcmask 64512   ;;  %v1860_v37 = vld [vmem:[%s4201_s5 + $0xe8] sm:$0xff] }
  0x32   :  { %845 = vperm.xlu1 %2978, %v835_v56   ;;  %840 = vperm.xlu0 %2977, %v834_v57   ;;  %v4278_v55 = vsel %vm3507_vm1, 4294967295, %v4277_v55  ;;  %v1555_v56 = vld [vmem:[%s4201_s5 + $0x98] sm:$0xff]  ;;  %v2984_v57 = vld [vmem:[%s4203_s4 + $0x28] sm:$0xff]  }
  0x33   :  { %2663 = vmatprep.mubr.msk.bf16.mxu1 %vm4279_vm9, %v2983_v33 }
  0x34   :  { %2694 = vmatpush3.bf16.msk.msra.mxu1 %vm3467_vm14, %v3012_v20 }
  0x35   :  { %2695 = vmatprep.subr.msk.bf16.mxu1 %vm3487_vm8, %v3012_v20 }
  0x36   :  { %855 = vperm.xlu1 %2978, %v837_v58   ;;  %850 = vperm.xlu0 %2977, %v836_v59   ;;  %v1554_v58 = vld [vmem:[%s4201_s5 + $0x90] sm:$0xff]  ;;  %v4280_v59 = vmov 0 }
  0x38   :  { %2696 = vmatpush3.bf16.msk.msra.mxu1 %vm3487_vm8, %v3012_v20  ;;  %vm3537_vm8 = vmpackc.low %vm92_vm3, %vm91_vm0  ;;  %vm93_vm0 = vcmp.eq.s32.totalorder %v3235_v42, %v3393_v45  ;;  %v1862_v42 = vld [vmem:[%s4201_s5 + $0xf8] sm:$0xff] }
  0x39   :  { %2697 = vmatprep.subr.msk.bf16.mxu1 %vm3507_vm1, %v3012_v20  ;;  %v4281_v59 = vsel %vm3537_vm8, 4294967295, %v4280_v59 }
  0x3a   :  { %305 = vperm.xlu1 %2978, %v43_v60   ;;  %302 = vperm.xlu0 %2977, %v42_v61   ;;  %v4283_v60 = vmov 0 }
  0x3c   :  { %2698 = vmatpush3.bf16.msk.msra.mxu1 %vm3507_vm1, %v3012_v20  ;;  %vm4282_vm1 = vmmov %vm4279_vm9 }
  0x3d   :  { %2664 = vmatmul.mubr.msk.bf16.gmra.mrb[4].mxu1 %vm4282_vm1, %v2984_v57  ;;  %2699 = vmatprep.subr.msk.bf16.mxu1 %vm3537_vm8, %v3012_v20  ;;  %vm94_vm1 = vcmp.eq.s32.totalorder %v3238_v43, %v3393_v45  ;;  %v1861_v43 = vld [vmem:[%s4201_s5 + $0xf0] sm:$0xff] }
  0x3e   :  { %311 = vperm.xlu1 %2978, %v45_v62   ;;  %308 = vperm.xlu0 %2977, %v44_v63   ;;  %vm3558_vm3 = vmpackc.low %vm94_vm1, %vm93_vm0 }
  0x3f   :  { %v4284_v60 = vsel %vm3558_vm3, 4294967295, %v4283_v60 }
  0x40   :  { %2700 = vmatpush3.bf16.msk.msra.mxu1 %vm3537_vm8, %v3012_v20 }
  0x41   :  { %2701 = vmatprep.subr.msk.bf16.mxu1 %vm3558_vm3, %v3012_v20 }
  0x42   :  { %317 = vperm.xlu1 %2978, %v47_v1   ;;  %314 = vperm.xlu0 %2977, %v46_v2   ;;  %v3583_v2 = vand.u32 127, %v58_v0  ;;  %v1866_v0 = vld [vmem:[%s4201_s5 + $0x118] sm:$0xff] }
  0x44   :  { %2702 = vmatpush3.bf16.msk.msra.mxu1 %vm3558_vm3, %v3012_v20 }
  0x46   :  { %323 = vperm.xlu1 %2978, %v49_v3   ;;  %320 = vperm.xlu0 %2977, %v48_v4   ;;  %v1864_v3 = vld [vmem:[%s4201_s5 + $0x108] sm:$0xff]  ;;  %v1863_v4 = vld [vmem:[%s4201_s5 + $0x100] sm:$0xff] }
  0x4a   :  { %329 = vperm.xlu1 %2978, %v51_v5   ;;  %326 = vperm.xlu0 %2977, %v50_v6  }
  0x4e   :  { %335 = vperm.xlu1 %2978, %v53_v7   ;;  %332 = vperm.xlu0 %2977, %v52_v8   ;;  %v1865_v8 = vld [vmem:[%s4201_s5 + $0x110] sm:$0xff] }
  0x4f   :  { %v2995_v7 = vld [vmem:[%s4203_s4 + $0xd0] sm:$0xff]  }
  0x52   :  { %341 = vperm.xlu1 %2978, %v55_v10   ;;  %338 = vperm.xlu0 %2977, %v54_v11  }
  0x56   :  { %1157 = vperm.xlu1 %2978, %v1143_v17   ;;  %1152 = vperm.xlu0 %2977, %v1142_v19   ;;  %v2001_v17 = vld [vmem:[%s4201_s5 + $0x148] sm:$0xff] }
  0x5a   :  { %347 = vperm.xlu1 %2978, %v57_v24   ;;  %344 = vperm.xlu0 %2977, %v56_v25   ;;  %v2000_v24 = vld [vmem:[%s4201_s5 + $0x140] sm:$0xff] }
  0x5e   :  { %1167 = vperm.xlu1 %2978, %v1145_v29   ;;  %1162 = vperm.xlu0 %2977, %v1144_v30   ;;  %v2003_v30 = vld [vmem:[%s4201_s5 + $0x158] sm:$0xff] }
  0x62   :  { %1177 = vperm.xlu1 %2978, %v1147_v34   ;;  %1172 = vperm.xlu0 %2977, %v1146_v39  }
  0x66   :  { %1187 = vperm.xlu1 %2978, %v1149_v47   ;;  %1182 = vperm.xlu0 %2977, %v1148_v48   ;;  %v2099_v47 = vld [vmem:[%s4201_s5 + $0x160] sm:$0xff] }
  0x6a   :  { %1294 = vperm.xlu1 %2978, %v1284_v9   ;;  %1289 = vperm.xlu0 %2977, %v1283_v13   ;;  %v2102_v9 = vld [vmem:[%s4201_s5 + $0x178] sm:$0xff] }
  0x6e   :  { %1304 = vperm.xlu1 %2978, %v1286_v14   ;;  %1299 = vperm.xlu0 %2977, %v1285_v15   ;;  %v2101_v14 = vld [vmem:[%s4201_s5 + $0x170] sm:$0xff] }
  0x72   :  { %548 = vperm.xlu1 %2978, %v518_v16   ;;  %543 = vperm.xlu0 %2977, %v517_v22  }
  0x76   :  { %558 = vperm.xlu1 %2978, %v520_v23   ;;  %553 = vperm.xlu0 %2977, %v519_v27   ;;  %v2195_v23 = vld [vmem:[%s4201_s5 + $0x180] sm:$0xff] }
  0x7a   :  { %1563 = vperm.xlu1 %2978, %v1553_v28   ;;  %1558 = vperm.xlu0 %2977, %v1552_v32  }
  0x7e   :  { %1573 = vperm.xlu1 %2978, %v1555_v56   ;;  %1568 = vperm.xlu0 %2977, %v1554_v58  }
  0x81   :  { %v3562_v61 = vpop.permute.xlu1 %426  ;;  %v3564_v62 = vpop.permute.xlu0 %416 }
  0x82   :  { %1874 = vperm.xlu1 %2978, %v1860_v37   ;;  %1869 = vperm.xlu0 %2977, %v1859_v38  }
  0x85   :  { %v3578_v63 = vpop.permute.xlu1 %431  ;;  %v3580_v1 = vpop.permute.xlu0 %421 }
  0x86   :  { %1884 = vperm.xlu1 %2978, %v1862_v42   ;;  %1879 = vperm.xlu0 %2977, %v1861_v43  }
  0x89   :  { %v142_v5 = vpop.permute.xlu1 %141  ;;  %v139_v6 = vpop.permute.xlu0 %138 }
  0x8a   :  { %vm186_vm9 = vcmp.eq.s32.totalorder %v3583_v2, %v142_v5  ;;  %1894 = vperm.xlu1 %2978, %v1864_v3   ;;  %vm185_vm0 = vcmp.eq.s32.totalorder %v3583_v2, %v139_v6  ;;  %1889 = vperm.xlu0 %2977, %v1863_v4  }
  0x8b   :  { %vm3596_vm1 = vmpackc.low %vm186_vm9, %vm185_vm0 }
  0x8c   :  { %2707 = vmatprep.subr.msk.bf16.mxu0 %vm3596_vm1, %v3012_v20 }
  0x8d   :  { %v148_v10 = vpop.permute.xlu1 %147  ;;  %v145_v11 = vpop.permute.xlu0 %144  ;;  %2708 = vmatpush3.bf16.msk.msra.mxu0 %vm3596_vm1, %v3012_v20 }
  0x8e   :  { %vm188_vm3 = vcmp.eq.s32.totalorder %v3583_v2, %v148_v10  ;;  %1904 = vperm.xlu1 %2978, %v1866_v0   ;;  %vm187_vm9 = vcmp.eq.s32.totalorder %v3583_v2, %v145_v11  ;;  %1899 = vperm.xlu0 %2977, %v1865_v8   ;;  %v4301_v8 = vmov 0 }
  0x8f   :  { %vm3614_vm0 = vmpackc.low %vm188_vm3, %vm187_vm9 }
  0x90   :  { %2709 = vmatprep.subr.msk.bf16.mxu0 %vm3614_vm0, %v3012_v20 }
  0x91   :  { %v154_v25 = vpop.permute.xlu1 %153  ;;  %v151_v29 = vpop.permute.xlu0 %150  ;;  %2710 = vmatpush3.bf16.msk.msra.mxu0 %vm3614_vm0, %v3012_v20 }
  0x92   :  { %vm190_vm8 = vcmp.eq.s32.totalorder %v3583_v2, %v154_v25  ;;  %2011 = vperm.xlu1 %2978, %v2001_v17   ;;  %vm189_vm3 = vcmp.eq.s32.totalorder %v3583_v2, %v151_v29  ;;  %2006 = vperm.xlu0 %2977, %v2000_v24  }
  0x93   :  { %vm3632_vm9 = vmpackc.low %vm190_vm8, %vm189_vm3 }
  0x94   :  { %2711 = vmatprep.subr.msk.bf16.mxu0 %vm3632_vm9, %v3012_v20 }
  0x95   :  { %v160_v39 = vpop.permute.xlu1 %159  ;;  %v157_v40 = vpop.permute.xlu0 %156  ;;  %2712 = vmatpush3.bf16.msk.msra.mxu0 %vm3632_vm9, %v3012_v20 }
  0x96   :  { %vm192_vm14 = vcmp.eq.s32.totalorder %v3583_v2, %v160_v39  ;;  %2021 = vperm.xlu1 %2978, %v2003_v30   ;;  %vm191_vm8 = vcmp.eq.s32.totalorder %v3583_v2, %v157_v40  ;;  %2016 = vperm.xlu0 %2977, %v2002_v35  }
  0x97   :  { %vm3650_vm3 = vmpackc.low %vm192_vm14, %vm191_vm8 }
  0x98   :  { %2713 = vmatprep.subr.msk.bf16.mxu0 %vm3650_vm3, %v3012_v20 }
  0x99   :  { %v166_v48 = vpop.permute.xlu1 %165  ;;  %v163_v51 = vpop.permute.xlu0 %162  ;;  %2714 = vmatpush3.bf16.msk.msra.mxu0 %vm3650_vm3, %v3012_v20 }
  0x9a   :  { %vm194_vm12 = vcmp.eq.s32.totalorder %v3583_v2, %v166_v48  ;;  %2110 = vperm.xlu1 %2978, %v2100_v44   ;;  %vm193_vm14 = vcmp.eq.s32.totalorder %v3583_v2, %v163_v51  ;;  %2105 = vperm.xlu0 %2977, %v2099_v47  }
  0x9b   :  { %vm3668_vm8 = vmpackc.low %vm194_vm12, %vm193_vm14 }
  0x9c   :  { %2715 = vmatprep.subr.msk.bf16.mxu0 %vm3668_vm8, %v3012_v20 }
  0x9d   :  { %v172_v15 = vpop.permute.xlu1 %171  ;;  %v169_v16 = vpop.permute.xlu0 %168  ;;  %2716 = vmatpush3.bf16.msk.msra.mxu0 %vm3668_vm8, %v3012_v20 }
  0x9e   :  { %vm196_vm4 = vcmp.eq.s32.totalorder %v3583_v2, %v172_v15  ;;  %2120 = vperm.xlu1 %2978, %v2102_v9   ;;  %vm195_vm12 = vcmp.eq.s32.totalorder %v3583_v2, %v169_v16  ;;  %2115 = vperm.xlu0 %2977, %v2101_v14  }
  0x9f   :  { %vm3683_vm14 = vmpackc.low %vm196_vm4, %vm195_vm12 }
  0xa0   :  { %2717 = vmatprep.subr.msk.bf16.mxu0 %vm3683_vm14, %v3012_v20 }
  0xa1   :  { %v178_v27 = vpop.permute.xlu1 %177  ;;  %v175_v28 = vpop.permute.xlu0 %174  ;;  %2718 = vmatpush3.bf16.msk.msra.mxu0 %vm3683_vm14, %v3012_v20 }
  0xa2   :  { %vm198_vm15 = vcmp.eq.s32.totalorder %v3583_v2, %v178_v27  ;;  %vm197_vm4 = vcmp.eq.s32.totalorder %v3583_v2, %v175_v28  ;;  %2198 = vperm.xlu0 %2977, %v2195_v23  }
  0xa3   :  { %vm3698_vm12 = vmpackc.low %vm198_vm15, %vm197_vm4 }
  0xa4   :  { %2719 = vmatprep.subr.msk.bf16.mxu0 %vm3698_vm12, %v3012_v20 }
  0xa5   :  { %v529_v33 = vpop.permute.xlu1 %528  ;;  %v524_v56 = vpop.permute.xlu0 %523  ;;  %2720 = vmatpush3.bf16.msk.msra.mxu0 %vm3698_vm12, %v3012_v20 }
  0xa9   :  { %v184_v57 = vpop.permute.xlu1 %183  ;;  %v181_v58 = vpop.permute.xlu0 %180 }
  0xaa   :  { %vm200_vm11 = vcmp.eq.s32.totalorder %v3583_v2, %v184_v57  ;;  %vm199_vm5 = vcmp.eq.s32.totalorder %v3583_v2, %v181_v58 }
  0xab   :  { %vm3710_vm15 = vmpackc.low %vm200_vm11, %vm199_vm5 }
  0xac   :  { %2721 = vmatprep.subr.msk.bf16.mxu0 %vm3710_vm15, %v3012_v20 }
  0xad   :  { %v539_v38 = vpop.permute.xlu1 %538  ;;  %v534_v42 = vpop.permute.xlu0 %533  ;;  %2722 = vmatpush3.bf16.msk.msra.mxu0 %vm3710_vm15, %v3012_v20 }
  0xb1   :  { %v3720_v43 = vpop.permute.xlu1 %845  ;;  %v3722_v3 = vpop.permute.xlu0 %840 }
  0xb5   :  { %v3724_v4 = vpop.permute.xlu1 %855  ;;  %v3726_v5 = vpop.permute.xlu0 %850 }
  0xb9   :  { %v306_v6 = vpop.permute.xlu1 %305  ;;  %v303_v0 = vpop.permute.xlu0 %302 }
  0xba   :  { %vm350_vm5 = vcmp.eq.s32.totalorder %v3583_v2, %v306_v6  ;;  %vm349_vm11 = vcmp.eq.s32.totalorder %v3583_v2, %v303_v0 }
  0xbb   :  { %vm3730_vm4 = vmpackc.low %vm350_vm5, %vm349_vm11 }
  0xbc   :  { %v4302_v8 = vsel %vm3730_vm4, 4294967295, %v4301_v8  ;;  %2759 = vmatprep.subr.msk.bf16.mxu0 %vm3730_vm4, %v3012_v20 }
  0xbd   :  { %v309_v16 = vpop.permute.xlu0 %308 }
  0xbe   :  { %vm351_vm11 = vcmp.eq.s32.totalorder %v3583_v2, %v309_v16 }
  0xc1   :  { %v315_v27 = vpop.permute.xlu0 %314 }
  0xc2   :  { %vm353_vm10 = vcmp.eq.s32.totalorder %v3583_v2, %v315_v27 }
  0xc5   :  { %v321_v0 = vpop.permute.xlu0 %320 }
  0xda   :  { %v2655_v10 = vpop.f32.mrb[0].mxu0 }
  0xdb   :  { %v489_v11 = vpop.f32.mrb[1].mxu0  ;;  %v498_v25 = vadd.f32 %v2655_v10, %v3562_v61 }
  0xdc   :  { %v2656_v17 = vpop.f32.mrb[2].mxu0  ;;  %v490_v29 = vadd.f32 %v489_v11, %v3564_v62 }
  0xdd   :  { %v492_v24 = vpop.f32.mrb[3].mxu0  ;;  %v501_v35 = vadd.f32 %v2656_v17, %v3578_v63 }
  0xde   :  { %v493_v44 = vadd.f32 %v492_v24, %v3580_v1  ;;  %v312_v1 = vpop.permute.xlu1 %311 }
  0xdf   :  { %vm352_vm5 = vcmp.eq.s32.totalorder %v3583_v2, %v312_v1 }
  0xe0   :  { %vm3759_vm2 = vmpackc.low %vm352_vm5, %vm351_vm11  ;;  %vm355_vm11 = vcmp.eq.s32.totalorder %v3583_v2, %v321_v0 }
  0xe2   :  { %v318_v23 = vpop.permute.xlu1 %317 }
  0xe3   :  { %vm354_vm13 = vcmp.eq.s32.totalorder %v3583_v2, %v318_v23  ;;  %v4309_v23 = vmov 0 }
  0xe4   :  { %vm3771_vm7 = vmpackc.low %vm354_vm13, %vm353_vm10 }
  0xe6   :  { %v324_v57 = vpop.permute.xlu1 %323 }
  0xe7   :  { %vm356_vm5 = vcmp.eq.s32.totalorder %v3583_v2, %v324_v57 }
  0xfb   :  { %v2685_v30 = vpop.f32.mrb[4].mxu0 }
  0xfc   :  { %v3740_v39 = vadd.f32 %v2685_v30, %v498_v25  ;;  %v695_v40 = vpop.f32.mrb[5].mxu0 }
  0xfd   :  { %v3743_v47 = vadd.f32 %v695_v40, %v490_v29  ;;  %v2686_v48 = vpop.f32.mrb[6].mxu0 }
  0xfe   :  { %v3745_v51 = vadd.f32 %v2686_v48, %v501_v35  ;;  %v3747_v9 = vpack.c.bf16 %v2686_v48, %v2685_v30  ;;  %v698_v14 = vpop.f32.mrb[7].mxu0  ;;  %v330_v48 = vpop.permute.xlu1 %329 }
  0xff   :  { %v3749_v15 = vadd.f32 %v698_v14, %v493_v44  ;;  %v3751_v61 = vpack.c.bf16 %v698_v14, %v695_v40  ;;  %v327_v14 = vpop.permute.xlu0 %326  ;;  %vm358_vm10 = vcmp.eq.s32.totalorder %v3583_v2, %v330_v48 }
 0x100   :  { %v715_v63 = vpack.c.bf16 %v3745_v51, %v3740_v39  ;;  %vm357_vm13 = vcmp.eq.s32.totalorder %v3583_v2, %v327_v14  ;;  %v2986_v14 = vld [vmem:[%s4203_s4 + $0x38] sm:$0xff]  }
 0x101   :  { %v714_v62 = vpack.c.bf16 %v3749_v15, %v3743_v47 }
 0x103   :  { %2703 = vmatprep.mubr.bf16.mxu1 %v714_v62 }
 0x104   :  { %2704 = vmatmul.mubr.bf16.vlgmr.msra.gmra.mrb[0].mxu1 %v715_v63  ;;  %v4307_v63 = vmov 0 }
 0x1d7   :  { %v2705_v28 = vpop.f32.mrb[0].mxu1 }
 0x1d8   :  { %v2939_v58 = vadd.f32 %v2705_v28, %v534_v42  ;;  %v750_v6 = vpop.f32.mrb[1].mxu1  ;;  %v4305_v42 = vmov 0 }
 0x1d9   :  { %v2940_v10 = vadd.f32 %v750_v6, %v524_v56  ;;  %v2706_v11 = vpop.f32.mrb[2].mxu1  ;;  %v4303_v56 = vmov 0  ;;  %v4306_v42 = vsel %vm3771_vm7, 4294967295, %v4305_v42 }
 0x1da   :  { %v2941_v17 = vadd.f32 %v2706_v11, %v539_v38  ;;  %v753_v24 = vpop.f32.mrb[3].mxu1  ;;  %v771_v29 = vmax.f32 %v2939_v58, 0.0  ;;  %v4304_v56 = vsel %vm3759_vm2, 4294967295, %v4303_v56  ;;  %v333_v38 = vpop.permute.xlu0 %332 }
 0x1db   :  { %v2942_v25 = vadd.f32 %v753_v24, %v529_v33  ;;  %v769_v35 = vmax.f32 %v2940_v10, 0.0  ;;  %v336_v33 = vpop.permute.xlu1 %335 }
 0x1dc   :  { %v772_v30 = vmax.f32 %v2941_v17, 0.0 }
 0x1dd   :  { %v770_v40 = vmax.f32 %v2942_v25, 0.0 }
 0x1de   :  { %v774_v44 = vpack.c.bf16 %v772_v30, %v771_v29  ;;  %v339_v16 = vpop.permute.xlu0 %338 }
 0x1df   :  { %v773_v62 = vpack.c.bf16 %v770_v40, %v769_v35  ;;  %v342_v1 = vpop.permute.xlu1 %341 }
 0x1e1   :  { %2723 = vmatprep.mubr.bf16.mxu0 %v773_v62 }
 0x1e2   :  { %2724 = vmatmul.mubr.bf16.vlgmr.msra.gmra.mrb[8].mxu0 %v774_v44  ;;  %v3809_v28 = vpop.permute.xlu0 %1152 }
 0x1e3   :  { %2760 = vmatpush3.bf16.msk.msra.mxu0 %vm3730_vm4, %v3012_v20  ;;  %vm3783_vm4 = vmpackc.low %vm356_vm5, %vm355_vm11  ;;  %vm360_vm5 = vcmp.eq.s32.totalorder %v3583_v2, %v336_v33  ;;  %vm359_vm11 = vcmp.eq.s32.totalorder %v3583_v2, %v333_v38  ;;  %v3807_v27 = vpop.permute.xlu1 %1157 }
 0x1e4   :  { %2761 = vmatprep.subr.msk.bf16.mxu0 %vm3759_vm2, %v3012_v20  ;;  %v4308_v63 = vsel %vm3783_vm4, 4294967295, %v4307_v63 }
 0x1e6   :  { %v345_v0 = vpop.permute.xlu0 %344 }
 0x1e7   :  { %2762 = vmatpush3.bf16.msk.msra.mxu0 %vm3759_vm2, %v3012_v20  ;;  %vm3795_vm2 = vmpackc.low %vm358_vm10, %vm357_vm13  ;;  %vm362_vm13 = vcmp.eq.s32.totalorder %v3583_v2, %v342_v1  ;;  %v348_v6 = vpop.permute.xlu1 %347 }
 0x1e8   :  { %2763 = vmatprep.subr.msk.bf16.mxu0 %vm3771_vm7, %v3012_v20  ;;  %v4310_v23 = vsel %vm3795_vm2, 4294967295, %v4309_v23  ;;  %vm3811_vm10 = vmpackc.low %vm360_vm5, %vm359_vm11  ;;  %vm364_vm5 = vcmp.eq.s32.totalorder %v3583_v2, %v348_v6  ;;  %vm363_vm11 = vcmp.eq.s32.totalorder %v3583_v2, %v345_v0 }
 0x1eb   :  { %2764 = vmatpush3.bf16.msk.msra.mxu0 %vm3771_vm7, %v3012_v20 }
 0x1ec   :  { %2765 = vmatprep.subr.msk.bf16.mxu0 %vm3783_vm4, %v3012_v20 }
 0x1ef   :  { %2766 = vmatpush3.bf16.msk.msra.mxu0 %vm3783_vm4, %v3012_v20  ;;  %vm361_vm4 = vcmp.eq.s32.totalorder %v3583_v2, %v339_v16  ;;  %v2985_v2 = vld [vmem:[%s4203_s4 + $0x30] sm:$0xff]  }
 0x1f0   :  { %2767 = vmatprep.subr.msk.bf16.mxu0 %vm3795_vm2, %v3012_v20  ;;  %vm3823_vm7 = vmpackc.low %vm362_vm13, %vm361_vm4  ;;  %vm868_vm4 = vcmask 261120   ;;  %vm4325_vm13 = vnez %v4270_v12 }
 0x1f1   :  { %2731 = vmatprep.mubr.msk.bf16.mxu1 %vm868_vm4, %v2985_v2 }
 0x1f3   :  { %2768 = vmatpush3.bf16.msk.msra.mxu0 %vm3795_vm2, %v3012_v20  ;;  %vm3835_vm2 = vmpackc.low %vm364_vm5, %vm363_vm11  ;;  %vm4326_vm5 = vnez %v4272_v52  ;;  %vm4327_vm11 = vnez %v4274_v53 }
 0x1f4   :  { %2769 = vmatprep.subr.msk.bf16.mxu0 %vm3811_vm10, %v3012_v20 }
 0x1f7   :  { %2770 = vmatpush3.bf16.msk.msra.mxu0 %vm3811_vm10, %v3012_v20 }
 0x1f8   :  { %2771 = vmatprep.subr.msk.bf16.mxu0 %vm3823_vm7, %v3012_v20 }
 0x1fb   :  { %2772 = vmatpush3.bf16.msk.msra.mxu0 %vm3823_vm7, %v3012_v20 }
 0x1fc   :  { %2773 = vmatprep.subr.msk.bf16.mxu0 %vm3835_vm2, %v3012_v20 }
 0x1ff   :  { %2774 = vmatpush3.bf16.msk.msra.mxu0 %vm3835_vm2, %v3012_v20 }
 0x200   :  { %2835 = vmatprep.subr.msk.bf16.mxu0 %vm3596_vm1, %v3012_v20 }
 0x2b5   :  { %v2725_v11 = vpop.f32.mrb[8].mxu0 }
 0x2b6   :  { %v809_v17 = vpop.f32.mrb[9].mxu0  ;;  %v830_v25 = vadd.f32 %v2725_v11, %v3740_v39  ;;  %v2987_v39 = vld [vmem:[%s4203_s4 + $0x90] sm:$0xff]   ;;  %v2989_v11 = vld [vmem:[%s4203_s4 + $0xa0] sm:$0xff]  }
 0x2b7   :  { %v2726_v24 = vpop.f32.mrb[10].mxu0  ;;  %v828_v35 = vadd.f32 %v809_v17, %v3743_v47  ;;  %v2990_v17 = vld [vmem:[%s4203_s4 + $0xa8] sm:$0xff]  }
 0x2b8   :  { %v831_v29 = vadd.f32 %v2726_v24, %v3745_v51  ;;  %v812_v30 = vpop.f32.mrb[11].mxu0  ;;  %v2991_v24 = vld [vmem:[%s4203_s4 + $0x50] sm:$0xff]  }
 0x2b9   :  { %v829_v40 = vadd.f32 %v812_v30, %v3749_v15  ;;  %v1168_v30 = vpop.permute.xlu1 %1167 }
 0x2ba   :  { %v833_v44 = vpack.c.bf16 %v831_v29, %v830_v25  ;;  %v2993_v25 = vld [vmem:[%s4203_s4 + $0x60] sm:$0xff]   ;;  %v1163_v29 = vpop.permute.xlu0 %1162 }
 0x2bb   :  { %v832_v48 = vpack.c.bf16 %v829_v40, %v828_v35 }
 0x2bd   :  { %2727 = vmatprep.subr.bf16.mxu1 %v832_v48 }
 0x2be   :  { %2728 = vmatpush3.bf16.msra.mxu1 %v832_v48  ;;  %v1173_v48 = vpop.permute.xlu0 %1172 }
 0x2bf   :  { %2729 = vmatprep.subr.bf16.mxu1 %v833_v44 }
 0x2c2   :  { %2730 = vmatpush3.bf16.msra.mxu1 %v833_v44 }
 0x2c5   :  { %2732 = vmatmul.mubr.msk.bf16.vlgmr.msra.gmra.mrb[8].mxu1 %vm868_vm4, %v2986_v14 }
 0x2c6   :  { %2739 = vmatprep.mubr.msk.bf16.mxu1 %vm868_vm4, %v2987_v39 }
 0x398   :  { %v2733_v47 = vpop.f32.mrb[8].mxu1 }
 0x399   :  { %v909_v51 = vpop.f32.mrb[9].mxu1  ;;  %v3874_v1 = vadd.f32 %v2733_v47, %v3726_v5 }
 0x39a   :  { %v3868_v15 = vadd.f32 %v909_v51, %v3722_v3  ;;  %v2734_v62 = vpop.f32.mrb[10].mxu1 }
 0x39b   :  { %v3871_v33 = vadd.f32 %v2734_v62, %v3724_v4  ;;  %v912_v38 = vpop.f32.mrb[11].mxu1  ;;  %v4249_v3 = vmax.f32 %v3874_v1, 0.0  ;;  %v1178_v62 = vpop.permute.xlu1 %1177 }
 0x39c   :  { %v3877_v16 = vadd.f32 %v912_v38, %v3720_v43  ;;  %v924_v6 = vmax.f32 %v3868_v15, 0.0  ;;  %v2988_v43 = vld [vmem:[%s4203_s4 + $0x98] sm:$0xff]  }
 0x39d   :  { %v927_v0 = vmax.f32 %v3871_v33, 0.0 }
 0x39e   :  { %v4250_v2 = vmax.f32 %v3877_v16, 0.0 }
 0x39f   :  { %v929_v5 = vpack.c.bf16 %v927_v0, %v4249_v3 }
 0x3a0   :  { %v928_v4 = vpack.c.bf16 %v4250_v2, %v924_v6 }
 0x3a2   :  { %2735 = vmatprep.subr.bf16.mxu1 %v928_v4 }
 0x3a3   :  { %2736 = vmatpush3.bf16.msra.mxu1 %v928_v4 }
 0x3a4   :  { %2737 = vmatprep.subr.bf16.mxu1 %v929_v5 }
 0x3a7   :  { %2738 = vmatpush3.bf16.msra.mxu1 %v929_v5 }
 0x3a8   :  { %2747 = vmatprep.subr.bf16.mxu1 %v3751_v61 }
 0x3aa   :  { %2740 = vmatmul.mubr.msk.bf16.vlgmr.msra.gmra.mrb[12].mxu1 %vm868_vm4, %v2988_v43 }
 0x3ab   :  { %2748 = vmatpush3.bf16.msra.mxu1 %v3751_v61  ;;  %2743 = vmatprep.mubr.msk.bf16.mxu1 %vm868_vm4, %v2989_v11  ;;  %v2992_v61 = vld [vmem:[%s4203_s4 + $0x58] sm:$0xff]  }
 0x3ac   :  { %2749 = vmatprep.subr.bf16.mxu1 %v3747_v9 }
 0x3af   :  { %2750 = vmatpush3.bf16.msra.mxu1 %v3747_v9  ;;  %v2994_v9 = vld [vmem:[%s4203_s4 + $0x68] sm:$0xff]  }
 0x3b2   :  { %2744 = vmatmul.mubr.msk.bf16.gmra.mrb[16].mxu1 %vm868_vm4, %v2990_v17 }
 0x3b3   :  { %2751 = vmatprep.mubr.msk.bf16.mxu1 %vm868_vm4, %v2991_v24  ;;  %v1183_v24 = vpop.permute.xlu0 %1182 }
 0x3b7   :  { %v1290_v18 = vpop.permute.xlu0 %1289 }
 0x3ba   :  { %2752 = vmatmul.mubr.msk.bf16.vlgmr.msra.gmra.mrb[12].mxu1 %vm868_vm4, %v2992_v61 }
 0x3bb   :  { %2755 = vmatprep.mubr.msk.bf16.mxu1 %vm868_vm4, %v2993_v25 }
 0x3c2   :  { %2756 = vmatmul.mubr.msk.bf16.gmra.mrb[16].mxu1 %vm868_vm4, %v2994_v9 }
 0x48d   :  { %v2753_v35 = vpop.f32.mrb[12].mxu1 }
 0x48e   :  { %v1192_v40 = vadd.f32 %v2753_v35, %v1163_v29  ;;  %v1111_v44 = vpop.f32.mrb[13].mxu1  ;;  %v1188_v35 = vpop.permute.xlu1 %1187 }
 0x48f   :  { %v1190_v14 = vadd.f32 %v3809_v28, %v1111_v44  ;;  %v2754_v39 = vpop.f32.mrb[14].mxu1 }
 0x490   :  { %v1193_v47 = vadd.f32 %v2754_v39, %v1168_v30  ;;  %v1114_v51 = vpop.f32.mrb[15].mxu1  ;;  %v1200_v4 = vmax.f32 %v1192_v40, 0.0 }
 0x491   :  { %v1191_v38 = vadd.f32 %v3807_v27, %v1114_v51  ;;  %v1198_v43 = vmax.f32 %v1190_v14, 0.0 }
 0x492   :  { %v1201_v5 = vmax.f32 %v1193_v47, 0.0 }
 0x493   :  { %v1199_v11 = vmax.f32 %v1191_v38, 0.0 }
 0x494   :  { %v1207_v17 = vpack.c.bf16 %v1201_v5, %v1200_v4  ;;  %v2996_v4 = vld [vmem:[%s4203_s4 + $0xd8] sm:$0xff]  }
 0x495   :  { %v1206_v61 = vpack.c.bf16 %v1199_v11, %v1198_v43  ;;  %v2757_v25 = vpop.f32.mrb[16].mxu1 }
 0x496   :  { %v1196_v9 = vadd.f32 %v2757_v25, %v1183_v24  ;;  %v1127_v29 = vpop.f32.mrb[17].mxu1 }
 0x497   :  { %v1194_v3 = vadd.f32 %v1173_v48, %v1127_v29  ;;  %v2758_v2 = vpop.f32.mrb[18].mxu1  ;;  %2775 = vmatprep.mubr.bf16.mxu0 %v1206_v61 }
 0x498   :  { %v1197_v28 = vadd.f32 %v2758_v2, %v1188_v35  ;;  %v1130_v30 = vpop.f32.mrb[19].mxu1  ;;  %2776 = vmatmul.mubr.bf16.vlgmr.msra.gmra.mrb[12].mxu0 %v1207_v17  ;;  %v1204_v27 = vmax.f32 %v1196_v9, 0.0 }
 0x499   :  { %v1195_v44 = vadd.f32 %v1178_v62, %v1130_v30  ;;  %2836 = vmatpush3.bf16.msk.msra.mxu0 %vm3596_vm1, %v3012_v20  ;;  %v1202_v14 = vmax.f32 %v1194_v3, 0.0  ;;  %vm1317_vm1 = vcmask 523264  }
 0x49a   :  { %v1205_v40 = vmax.f32 %v1197_v28, 0.0  ;;  %2837 = vmatprep.subr.msk.bf16.mxu0 %vm3614_vm0, %v3012_v20  ;;  %2791 = vmatprep.mubr.msk.bf16.mxu1 %vm1317_vm1, %v2995_v7  ;;  %v4333_v28 = vmax.f32 %v3877_v16, 0.0 }
 0x49b   :  { %v1203_v39 = vmax.f32 %v1195_v44, 0.0  ;;  %v4334_v44 = vmax.f32 %v3874_v1, 0.0 }
 0x49c   :  { %v1209_v47 = vpack.c.bf16 %v1205_v40, %v1204_v27 }
 0x49d   :  { %v1208_v48 = vpack.c.bf16 %v1203_v39, %v1202_v14  ;;  %2838 = vmatpush3.bf16.msk.msra.mxu0 %vm3614_vm0, %v3012_v20  ;;  %vm4317_vm0 = vnez %v4254_v21  ;;  %v1295_v21 = vpop.permute.xlu1 %1294 }
 0x49e   :  { %2839 = vmatprep.subr.msk.bf16.mxu0 %vm3632_vm9, %v3012_v20 }
 0x49f   :  { %2779 = vmatprep.mubr.bf16.mxu0 %v1208_v48 }
 0x4a0   :  { %2780 = vmatmul.mubr.bf16.gmra.mrb[16].mxu0 %v1209_v47 }
 0x4a1   :  { %2840 = vmatpush3.bf16.msk.msra.mxu0 %vm3632_vm9, %v3012_v20  ;;  %vm4318_vm9 = vnez %v4256_v26  ;;  %v1300_v26 = vpop.permute.xlu0 %1299 }
 0x4a2   :  { %2841 = vmatprep.subr.msk.bf16.mxu0 %vm3650_vm3, %v3012_v20 }
 0x4a5   :  { %2842 = vmatpush3.bf16.msk.msra.mxu0 %vm3650_vm3, %v3012_v20  ;;  %vm4319_vm3 = vnez %v4258_v31 }
 0x4a6   :  { %2843 = vmatprep.subr.msk.bf16.mxu0 %vm3668_vm8, %v3012_v20 }
 0x4a9   :  { %2844 = vmatpush3.bf16.msk.msra.mxu0 %vm3668_vm8, %v3012_v20  ;;  %vm4321_vm8 = vnez %v4262_v41 }
 0x4aa   :  { %2845 = vmatprep.subr.msk.bf16.mxu0 %vm3683_vm14, %v3012_v20 }
 0x4ad   :  { %2846 = vmatpush3.bf16.msk.msra.mxu0 %vm3683_vm14, %v3012_v20  ;;  %vm4322_vm14 = vnez %v4264_v46  ;;  %v1305_v46 = vpop.permute.xlu1 %1304 }
 0x4ae   :  { %2847 = vmatprep.subr.msk.bf16.mxu0 %vm3698_vm12, %v3012_v20 }
 0x4b1   :  { %2848 = vmatpush3.bf16.msk.msra.mxu0 %vm3698_vm12, %v3012_v20  ;;  %vm4323_vm12 = vnez %v4266_v49 }
 0x4b2   :  { %2849 = vmatprep.subr.msk.bf16.mxu0 %vm3710_vm15, %v3012_v20 }
 0x4b5   :  { %2850 = vmatpush3.bf16.msk.msra.mxu0 %vm3710_vm15, %v3012_v20  ;;  %vm4324_vm15 = vnez %v4268_v50 }
 0x56b   :  { %v2777_v19 = vpop.f32.mrb[12].mxu0 }
 0x56c   :  { %v1244_v34 = vpop.f32.mrb[13].mxu0 }
 0x56d   :  { %v2778_v45 = vpop.f32.mrb[14].mxu0 }
 0x56e   :  { %v1280_v13 = vpack.c.bf16 %v2778_v45, %v2777_v19  ;;  %v1247_v22 = vpop.f32.mrb[15].mxu0 }
 0x56f   :  { %v1279_v32 = vpack.c.bf16 %v1247_v22, %v1244_v34 }
 0x571   :  { %2783 = vmatprep.subr.bf16.mxu1 %v1279_v32 }
 0x572   :  { %2784 = vmatpush3.bf16.msra.mxu1 %v1279_v32 }
 0x573   :  { %v2781_v2 = vpop.f32.mrb[16].mxu0  ;;  %2785 = vmatprep.subr.bf16.mxu1 %v1280_v13 }
 0x574   :  { %v1260_v3 = vpop.f32.mrb[17].mxu0 }
 0x575   :  { %v2782_v37 = vpop.f32.mrb[18].mxu0 }
 0x576   :  { %v1282_v51 = vpack.c.bf16 %v2782_v37, %v2781_v2  ;;  %v1263_v62 = vpop.f32.mrb[19].mxu0  ;;  %2786 = vmatpush3.bf16.msra.mxu1 %v1280_v13 }
 0x577   :  { %v1281_v38 = vpack.c.bf16 %v1263_v62, %v1260_v3  ;;  %v2998_v62 = vld [vmem:[%s4203_s4 + $0x48] sm:$0xff]  }
 0x579   :  { %2787 = vmatprep.subr.bf16.mxu1 %v1281_v38 }
 0x57a   :  { %2788 = vmatpush3.bf16.msra.mxu1 %v1281_v38  ;;  %v2999_v38 = vld [vmem:[%s4203_s4 + $0xb0] sm:$0xff]  }
 0x57b   :  { %2789 = vmatprep.subr.bf16.mxu1 %v1282_v51 }
 0x57e   :  { %2790 = vmatpush3.bf16.msra.mxu1 %v1282_v51 }
 0x57f   :  { %2795 = vmatprep.subr.msk.bf16.mxu1 %vm3111_vm6, %v3012_v20 }
 0x581   :  { %2792 = vmatmul.mubr.msk.bf16.vlgmr.msra.gmra.mrb[20].mxu1 %vm1317_vm1, %v2996_v4 }
 0x582   :  { %2796 = vmatpush3.bf16.msk.msra.mxu1 %vm3111_vm6, %v3012_v20  ;;  %vm4320_vm6 = vnez %v4260_v36 }
 0x583   :  { %2797 = vmatprep.subr.msk.bf16.mxu1 %vm4317_vm0, %v3012_v20 }
 0x586   :  { %2798 = vmatpush3.bf16.msk.msra.mxu1 %vm4317_vm0, %v3012_v20  ;;  %vm4328_vm0 = vnez %v4276_v54 }
 0x587   :  { %2799 = vmatprep.subr.msk.bf16.mxu1 %vm4318_vm9, %v3012_v20 }
 0x58a   :  { %2800 = vmatpush3.bf16.msk.msra.mxu1 %vm4318_vm9, %v3012_v20  ;;  %vm4329_vm9 = vnez %v4278_v55 }
 0x58b   :  { %2801 = vmatprep.subr.msk.bf16.mxu1 %vm4319_vm3, %v3012_v20 }
 0x58e   :  { %2802 = vmatpush3.bf16.msk.msra.mxu1 %vm4319_vm3, %v3012_v20  ;;  %vm4330_vm3 = vnez %v4281_v59 }
 0x58f   :  { %2803 = vmatprep.subr.msk.bf16.mxu1 %vm4320_vm6, %v3012_v20 }
 0x592   :  { %2804 = vmatpush3.bf16.msk.msra.mxu1 %vm4320_vm6, %v3012_v20  ;;  %vm4331_vm6 = vnez %v4284_v60 }
 0x593   :  { %2805 = vmatprep.subr.msk.bf16.mxu1 %vm4321_vm8, %v3012_v20 }
 0x596   :  { %2806 = vmatpush3.bf16.msk.msra.mxu1 %vm4321_vm8, %v3012_v20  ;;  %vm4332_vm8 = vnez %v4302_v8  ;;  %v544_v8 = vpop.permute.xlu0 %543 }
 0x597   :  { %2807 = vmatprep.subr.msk.bf16.mxu1 %vm4322_vm14, %v3012_v20 }
 0x59a   :  { %2808 = vmatpush3.bf16.msk.msra.mxu1 %vm4322_vm14, %v3012_v20  ;;  %vm4335_vm14 = vnez %v4304_v56  ;;  %v549_v56 = vpop.permute.xlu1 %548 }
 0x59b   :  { %2809 = vmatprep.subr.msk.bf16.mxu1 %vm4323_vm12, %v3012_v20 }
 0x59e   :  { %2810 = vmatpush3.bf16.msk.msra.mxu1 %vm4323_vm12, %v3012_v20  ;;  %vm4336_vm12 = vnez %v4306_v42  ;;  %v554_v42 = vpop.permute.xlu0 %553  ;;  %v559_v15 = vpop.permute.xlu1 %558 }
 0x59f   :  { %2815 = vmatprep.subr.msk.bf16.mxu1 %vm4324_vm15, %v3012_v20 }
 0x5a2   :  { %v1559_v4 = vpop.permute.xlu0 %1558 }
 0x654   :  { %v2793_v31 = vpop.f32.mrb[20].mxu1 }
 0x655   :  { %v1367_v36 = vadd.f32 %v2793_v31, %v1300_v26  ;;  %v1358_v41 = vpop.f32.mrb[21].mxu1 }
 0x656   :  { %v1359_v5 = vadd.f32 %v1358_v41, %v1290_v18  ;;  %v2794_v43 = vpop.f32.mrb[22].mxu1  ;;  %v1564_v18 = vpop.permute.xlu1 %1563 }
 0x657   :  { %v1370_v11 = vadd.f32 %v2794_v43, %v1305_v46  ;;  %v1361_v17 = vpop.f32.mrb[23].mxu1  ;;  %v1375_v61 = vmax.f32 %v1367_v36, 0.0 }
 0x658   :  { %v1362_v24 = vadd.f32 %v1361_v17, %v1295_v21  ;;  %v1373_v49 = vmax.f32 %v1359_v5, 0.0  ;;  %v1569_v21 = vpop.permute.xlu0 %1568 }
 0x659   :  { %v1376_v25 = vmax.f32 %v1370_v11, 0.0 }
 0x65a   :  { %v1374_v9 = vmax.f32 %v1362_v24, 0.0  ;;  %v1574_v41 = vpop.permute.xlu1 %1573 }
 0x65b   :  { %v1378_v29 = vpack.c.bf16 %v1376_v25, %v1375_v61 }
 0x65c   :  { %v1377_v35 = vpack.c.bf16 %v1374_v9, %v1373_v49 }
 0x65e   :  { %2811 = vmatprep.mubr.bf16.mxu1 %v1377_v35  ;;  %v3000_v35 = vld [vmem:[%s4203_s4 + $0xb8] sm:$0xff]  }
 0x65f   :  { %2812 = vmatmul.mubr.bf16.vlgmr.msra.gmra.mrb[24].mxu1 %v1378_v29 }
 0x660   :  { %2816 = vmatpush3.bf16.msk.msra.mxu1 %vm4324_vm15, %v3012_v20  ;;  %vm4337_vm15 = vnez %v4308_v63 }
 0x661   :  { %2817 = vmatprep.subr.msk.bf16.mxu1 %vm4325_vm13, %v3012_v20 }
 0x664   :  { %2818 = vmatpush3.bf16.msk.msra.mxu1 %vm4325_vm13, %v3012_v20  ;;  %vm4338_vm13 = vnez %v4310_v23 }
 0x665   :  { %2819 = vmatprep.subr.msk.bf16.mxu1 %vm4326_vm5, %v3012_v20 }
 0x668   :  { %2820 = vmatpush3.bf16.msk.msra.mxu1 %vm4326_vm5, %v3012_v20 }
 0x669   :  { %2821 = vmatprep.subr.msk.bf16.mxu1 %vm4327_vm11, %v3012_v20 }
 0x66c   :  { %2822 = vmatpush3.bf16.msk.msra.mxu1 %vm4327_vm11, %v3012_v20 }
 0x66d   :  { %2823 = vmatprep.subr.msk.bf16.mxu1 %vm4328_vm0, %v3012_v20 }
 0x670   :  { %2824 = vmatpush3.bf16.msk.msra.mxu1 %vm4328_vm0, %v3012_v20 }
 0x671   :  { %2825 = vmatprep.subr.msk.bf16.mxu1 %vm4329_vm9, %v3012_v20 }
 0x674   :  { %2826 = vmatpush3.bf16.msk.msra.mxu1 %vm4329_vm9, %v3012_v20 }
 0x675   :  { %2827 = vmatprep.subr.msk.bf16.mxu1 %vm4330_vm3, %v3012_v20 }
 0x678   :  { %2828 = vmatpush3.bf16.msk.msra.mxu1 %vm4330_vm3, %v3012_v20 }
 0x679   :  { %2829 = vmatprep.subr.msk.bf16.mxu1 %vm4331_vm6, %v3012_v20 }
 0x67c   :  { %2830 = vmatpush3.bf16.msk.msra.mxu1 %vm4331_vm6, %v3012_v20 }
 0x67d   :  { %2887 = vmatprep.subr.msk.bf16.mxu1 %vm4332_vm8, %v3012_v20 }
 0x732   :  { %v2813_v50 = vpop.f32.mrb[24].mxu1 }
 0x733   :  { %v1413_v12 = vpop.f32.mrb[25].mxu1  ;;  %v1430_v27 = vadd.f32 %v2813_v50, %v4334_v44 }
 0x734   :  { %v2814_v52 = vpop.f32.mrb[26].mxu1  ;;  %v1428_v59 = vadd.f32 %v1413_v12, %v924_v6 }
 0x735   :  { %v1431_v53 = vadd.f32 %v2814_v52, %v927_v0  ;;  %v4079_v54 = vpack.c.bf16 %v2814_v52, %v2813_v50  ;;  %v1416_v55 = vpop.f32.mrb[27].mxu1  ;;  %v3001_v50 = vld [vmem:[%s4203_s4 + $0xc0] sm:$0xff]   ;;  %v3003_v52 = vld [vmem:[%s4203_s4 + $0x70] sm:$0xff]  }
 0x736   :  { %v1429_v60 = vadd.f32 %v1416_v55, %v4333_v28  ;;  %v4085_v30 = vpack.c.bf16 %v1416_v55, %v1413_v12  ;;  %v3002_v12 = vld [vmem:[%s4203_s4 + $0xc8] sm:$0xff]   ;;  %v3005_v55 = vld [vmem:[%s4203_s4 + $0x80] sm:$0xff]   ;;  %v1875_v28 = vpop.permute.xlu1 %1874 }
 0x737   :  { %v1433_v14 = vpack.c.bf16 %v1431_v53, %v1430_v27 }
 0x738   :  { %v1432_v40 = vpack.c.bf16 %v1429_v60, %v1428_v59 }
 0x73a   :  { %2831 = vmatprep.mubr.bf16.mxu1 %v1432_v40 }
 0x73b   :  { %2832 = vmatmul.mubr.bf16.vlgmr.msra.gmra.mrb[4].mxu1 %v1433_v14 }
 0x73c   :  { %2888 = vmatpush3.bf16.msk.msra.mxu1 %vm4332_vm8, %v3012_v20 }
 0x73d   :  { %2889 = vmatprep.subr.msk.bf16.mxu1 %vm4335_vm14, %v3012_v20 }
 0x740   :  { %2890 = vmatpush3.bf16.msk.msra.mxu1 %vm4335_vm14, %v3012_v20 }
 0x741   :  { %2891 = vmatprep.subr.msk.bf16.mxu1 %vm4336_vm12, %v3012_v20 }
 0x744   :  { %2892 = vmatpush3.bf16.msk.msra.mxu1 %vm4336_vm12, %v3012_v20 }
 0x745   :  { %2893 = vmatprep.subr.msk.bf16.mxu1 %vm4337_vm15, %v3012_v20 }
 0x748   :  { %2894 = vmatpush3.bf16.msk.msra.mxu1 %vm4337_vm15, %v3012_v20 }
 0x749   :  { %2895 = vmatprep.subr.msk.bf16.mxu1 %vm4338_vm13, %v3012_v20 }
 0x74c   :  { %2896 = vmatpush3.bf16.msk.msra.mxu1 %vm4338_vm13, %v3012_v20 }
 0x74d   :  { %2897 = vmatprep.subr.msk.bf16.mxu1 %vm3811_vm10, %v3012_v20 }
 0x750   :  { %2898 = vmatpush3.bf16.msk.msra.mxu1 %vm3811_vm10, %v3012_v20 }
 0x751   :  { %2899 = vmatprep.subr.msk.bf16.mxu1 %vm3823_vm7, %v3012_v20 }
 0x754   :  { %2900 = vmatpush3.bf16.msk.msra.mxu1 %vm3823_vm7, %v3012_v20  ;;  %vm3014_vm7 = vmmov 0  }
 0x755   :  { %2901 = vmatprep.subr.msk.bf16.mxu1 %vm3835_vm2, %v3012_v20 }
 0x758   :  { %2902 = vmatpush3.bf16.msk.msra.mxu1 %vm3835_vm2, %v3012_v20  ;;  %v2997_v20 = vld [vmem:[%s4203_s4 + $0x40] sm:$0xff]  }
 0x80e   :  { %v2833_v63 = vpop.f32.mrb[4].mxu1 }
 0x80f   :  { %v2943_v23 = vadd.f32 %v2833_v63, %v554_v42  ;;  %v1468_v57 = vpop.f32.mrb[5].mxu1 }
 0x810   :  { %v2944_v33 = vadd.f32 %v1468_v57, %v544_v8  ;;  %v2834_v1 = vpop.f32.mrb[6].mxu1 }
 0x811   :  { %v2945_v16 = vadd.f32 %v2834_v1, %v559_v15  ;;  %v1471_v58 = vpop.f32.mrb[7].mxu1  ;;  %v1489_v0 = vmax.f32 %v2943_v23, 0.0 }
 0x812   :  { %v2946_v6 = vadd.f32 %v1471_v58, %v549_v56  ;;  %v1487_v47 = vmax.f32 %v2944_v33, 0.0 }
 0x813   :  { %v1490_v39 = vmax.f32 %v2945_v16, 0.0 }
 0x814   :  { %v1488_v48 = vmax.f32 %v2946_v6, 0.0 }
 0x815   :  { %v1492_v7 = vpack.c.bf16 %v1490_v39, %v1489_v0 }
 0x816   :  { %v1491_v19 = vpack.c.bf16 %v1488_v48, %v1487_v47 }
 0x818   :  { %2851 = vmatprep.mubr.bf16.mxu0 %v1491_v19 }
 0x819   :  { %2852 = vmatmul.mubr.bf16.vlgmr.msra.gmra.mrb[20].mxu0 %v1492_v7 }
 0x81a   :  { %2859 = vmatprep.mubr.msk.bf16.mxu0 %vm868_vm4, %v2997_v20 }
 0x8ec   :  { %v2853_v10 = vpop.f32.mrb[20].mxu0 }
 0x8ed   :  { %v1527_v34 = vpop.f32.mrb[21].mxu0  ;;  %v1548_v13 = vadd.f32 %v2853_v10, %v1430_v27 }
 0x8ee   :  { %v2854_v45 = vpop.f32.mrb[22].mxu0  ;;  %v1546_v2 = vadd.f32 %v1527_v34, %v1428_v59  ;;  %v1870_v59 = vpop.permute.xlu0 %1869 }
 0x8ef   :  { %v1549_v22 = vadd.f32 %v2854_v45, %v1431_v53  ;;  %v1530_v32 = vpop.f32.mrb[23].mxu0  ;;  %v3004_v53 = vld [vmem:[%s4203_s4 + $0x78] sm:$0xff]  }
 0x8f0   :  { %v1547_v3 = vadd.f32 %v1530_v32, %v1429_v60 }
 0x8f1   :  { %v1551_v37 = vpack.c.bf16 %v1549_v22, %v1548_v13 }
 0x8f2   :  { %v1550_v51 = vpack.c.bf16 %v1547_v3, %v1546_v2  ;;  %v1880_v60 = vpop.permute.xlu0 %1879 }
 0x8f4   :  { %2855 = vmatprep.subr.bf16.mxu0 %v1550_v51 }
 0x8f5   :  { %2856 = vmatpush3.bf16.msra.mxu0 %v1550_v51  ;;  %v3007_v51 = vld [vmem:[%s4203_s4 + $0xe0] sm:$0xff]  }
 0x8f6   :  { %2857 = vmatprep.subr.bf16.mxu0 %v1551_v37  ;;  %v1890_v14 = vpop.permute.xlu0 %1889 }
 0x8f9   :  { %2858 = vmatpush3.bf16.msra.mxu0 %v1551_v37 }
 0x8fa   :  { %v1900_v6 = vpop.permute.xlu0 %1899 }
 0x8fc   :  { %2860 = vmatmul.mubr.msk.bf16.vlgmr.msra.gmra.mrb[24].mxu0 %vm868_vm4, %v2998_v62 }
 0x8fd   :  { %2867 = vmatprep.mubr.msk.bf16.mxu0 %vm868_vm4, %v2999_v38 }
 0x9cf   :  { %v2861_v26 = vpop.f32.mrb[24].mxu0 }
 0x9d0   :  { %v1635_v31 = vadd.f32 %v2861_v26, %v1569_v21  ;;  %v1626_v36 = vpop.f32.mrb[25].mxu0 }
 0x9d1   :  { %v1627_v46 = vadd.f32 %v1626_v36, %v1559_v4  ;;  %v2862_v5 = vpop.f32.mrb[26].mxu0 }
 0x9d2   :  { %v1638_v43 = vadd.f32 %v2862_v5, %v1574_v41  ;;  %v1629_v11 = vpop.f32.mrb[27].mxu0  ;;  %v1643_v24 = vmax.f32 %v1635_v31, 0.0 }
 0x9d3   :  { %v1630_v17 = vadd.f32 %v1629_v11, %v1564_v18  ;;  %v1641_v25 = vmax.f32 %v1627_v46, 0.0  ;;  %v3008_v11 = vld [vmem:[%s4203_s4 + $0xe8] sm:$0xff]  }
 0x9d4   :  { %v1644_v61 = vmax.f32 %v1638_v43, 0.0 }
 0x9d5   :  { %v1642_v49 = vmax.f32 %v1630_v17, 0.0  ;;  %v3009_v17 = vld [vmem:[%s4203_s4 + $0xf0] sm:$0xff]  }
 0x9d6   :  { %v1646_v9 = vpack.c.bf16 %v1644_v61, %v1643_v24  ;;  %v2007_v24 = vpop.permute.xlu0 %2006 }
 0x9d7   :  { %v1645_v29 = vpack.c.bf16 %v1642_v49, %v1641_v25 }
 0x9d9   :  { %2863 = vmatprep.subr.bf16.mxu0 %v1645_v29 }
 0x9da   :  { %2864 = vmatpush3.bf16.msra.mxu0 %v1645_v29  ;;  %v2017_v25 = vpop.permute.xlu0 %2016 }
 0x9db   :  { %2865 = vmatprep.subr.bf16.mxu0 %v1646_v9 }
 0x9de   :  { %2866 = vmatpush3.bf16.msra.mxu0 %v1646_v9 }
 0x9df   :  { %2875 = vmatprep.subr.bf16.mxu0 %v4085_v30 }
 0x9e1   :  { %2868 = vmatmul.mubr.msk.bf16.vlgmr.msra.gmra.mrb[28].mxu0 %vm868_vm4, %v3000_v35 }
 0x9e2   :  { %2876 = vmatpush3.bf16.msra.mxu0 %v4085_v30  ;;  %2871 = vmatprep.mubr.msk.bf16.mxu0 %vm868_vm4, %v3001_v50  ;;  %v1885_v30 = vpop.permute.xlu1 %1884 }
 0x9e3   :  { %2877 = vmatprep.subr.bf16.mxu0 %v4079_v54 }
 0x9e6   :  { %2878 = vmatpush3.bf16.msra.mxu0 %v4079_v54  ;;  %v3006_v54 = vld [vmem:[%s4203_s4 + $0x88] sm:$0xff]   ;;  %v1895_v23 = vpop.permute.xlu1 %1894 }
 0x9e9   :  { %2872 = vmatmul.mubr.msk.bf16.gmra.mrb[32].mxu0 %vm868_vm4, %v3002_v12 }
 0x9ea   :  { %2879 = vmatprep.mubr.msk.bf16.mxu0 %vm868_vm4, %v3003_v52  ;;  %v1905_v7 = vpop.permute.xlu1 %1904 }
 0x9ee   :  { %v2012_v61 = vpop.permute.xlu1 %2011 }
 0x9f1   :  { %2880 = vmatmul.mubr.msk.bf16.vlgmr.msra.gmra.mrb[28].mxu0 %vm868_vm4, %v3004_v53 }
 0x9f2   :  { %2883 = vmatprep.mubr.msk.bf16.mxu0 %vm868_vm4, %v3005_v55  ;;  %v2022_v35 = vpop.permute.xlu1 %2021 }
 0x9f9   :  { %2884 = vmatmul.mubr.msk.bf16.gmra.mrb[32].mxu0 %vm868_vm4, %v3006_v54 }
 0x9fa   :  { %2919 = vmatprep.mubr.msk.bf16.mxu0 %vm1317_vm1, %v3007_v51 }
 0xac4   :  { %v2881_v44 = vpop.f32.mrb[28].mxu0 }
 0xac5   :  { %v1909_v27 = vadd.f32 %v2881_v44, %v1880_v60  ;;  %v1828_v40 = vpop.f32.mrb[29].mxu0 }
 0xac6   :  { %v1907_v8 = vadd.f32 %v1870_v59, %v1828_v40  ;;  %v2882_v56 = vpop.f32.mrb[30].mxu0  ;;  %v3013_v40 = vmov 0.0  }
 0xac7   :  { %v1910_v42 = vadd.f32 %v2882_v56, %v1885_v30  ;;  %v1831_v63 = vpop.f32.mrb[31].mxu0  ;;  %v1917_v15 = vmax.f32 %v1909_v27, 0.0  ;;  %v3010_v27 = vld [vmem:[%s4203_s4 + $0xf8] sm:$0xff]  }
 0xac8   :  { %v1908_v57 = vadd.f32 %v1875_v28, %v1831_v63  ;;  %v1915_v1 = vmax.f32 %v1907_v8, 0.0  ;;  %v2111_v8 = vpop.permute.xlu1 %2110 }
 0xac9   :  { %v1918_v33 = vmax.f32 %v1910_v42, 0.0 }
 0xaca   :  { %v1916_v16 = vmax.f32 %v1908_v57, 0.0 }
 0xacb   :  { %v1924_v58 = vpack.c.bf16 %v1918_v33, %v1917_v15 }
 0xacc   :  { %v1923_v0 = vpack.c.bf16 %v1916_v16, %v1915_v1  ;;  %v2885_v39 = vpop.f32.mrb[32].mxu0  ;;  %v2121_v57 = vpop.permute.xlu1 %2120 }
 0xacd   :  { %v1913_v47 = vadd.f32 %v2885_v39, %v1900_v6  ;;  %v1844_v48 = vpop.f32.mrb[33].mxu0 }
 0xace   :  { %v1911_v19 = vadd.f32 %v1890_v14, %v1844_v48  ;;  %v2886_v20 = vpop.f32.mrb[34].mxu0  ;;  %2903 = vmatprep.mubr.bf16.mxu1 %v1923_v0  ;;  %v2106_v14 = vpop.permute.xlu0 %2105 }
 0xacf   :  { %v1914_v10 = vadd.f32 %v2886_v20, %v1905_v7  ;;  %v1847_v34 = vpop.f32.mrb[35].mxu0  ;;  %2904 = vmatmul.mubr.bf16.vlgmr.msra.gmra.mrb[28].mxu1 %v1924_v58  ;;  %v1921_v13 = vmax.f32 %v1913_v47, 0.0 }
 0xad0   :  { %v1912_v45 = vadd.f32 %v1895_v23, %v1847_v34  ;;  %v1919_v32 = vmax.f32 %v1911_v19, 0.0  ;;  %v2192_v19 = vld [vmem:[%s4203_s4 + $0x100] sm:$0xf] }
 0xad1   :  { %v1922_v22 = vmax.f32 %v1914_v10, 0.0 }
 0xad2   :  { %v1920_v2 = vmax.f32 %v1912_v45, 0.0  ;;  %v2116_v56 = vpop.permute.xlu0 %2115 }
 0xad3   :  { %v1926_v3 = vpack.c.bf16 %v1922_v22, %v1921_v13 }
 0xad4   :  { %v1925_v37 = vpack.c.bf16 %v1920_v2, %v1919_v32 }
 0xad6   :  { %2907 = vmatprep.mubr.bf16.mxu1 %v1925_v37  ;;  %v2199_v20 = vpop.permute.xlu0 %2198 }
 0xad7   :  { %2908 = vmatmul.mubr.bf16.gmra.mrb[32].mxu1 %v1926_v3 }
 0xba2   :  { %v2905_v62 = vpop.f32.mrb[28].mxu1 }
 0xba3   :  { %v1961_v38 = vpop.f32.mrb[29].mxu1 }
 0xba4   :  { %v2906_v4 = vpop.f32.mrb[30].mxu1 }
 0xba5   :  { %v1997_v18 = vpack.c.bf16 %v2906_v4, %v2905_v62  ;;  %v1964_v21 = vpop.f32.mrb[31].mxu1 }
 0xba6   :  { %v1996_v26 = vpack.c.bf16 %v1964_v21, %v1961_v38 }
 0xba8   :  { %2911 = vmatprep.subr.bf16.mxu0 %v1996_v26 }
 0xba9   :  { %2912 = vmatpush3.bf16.msra.mxu0 %v1996_v26 }
 0xbaa   :  { %v2909_v31 = vpop.f32.mrb[32].mxu1  ;;  %2913 = vmatprep.subr.bf16.mxu0 %v1997_v18 }
 0xbab   :  { %v1977_v36 = vpop.f32.mrb[33].mxu1 }
 0xbac   :  { %v2910_v41 = vpop.f32.mrb[34].mxu1 }
 0xbad   :  { %v1999_v46 = vpack.c.bf16 %v2910_v41, %v2909_v31  ;;  %v1980_v5 = vpop.f32.mrb[35].mxu1  ;;  %2914 = vmatpush3.bf16.msra.mxu0 %v1997_v18 }
 0xbae   :  { %v1998_v43 = vpack.c.bf16 %v1980_v5, %v1977_v36 }
 0xbb0   :  { %2915 = vmatprep.subr.bf16.mxu0 %v1998_v43 }
 0xbb1   :  { %2916 = vmatpush3.bf16.msra.mxu0 %v1998_v43 }
 0xbb2   :  { %2917 = vmatprep.subr.bf16.mxu0 %v1999_v46 }
 0xbb5   :  { %2918 = vmatpush3.bf16.msra.mxu0 %v1999_v46 }
 0xbb8   :  { %2920 = vmatmul.mubr.msk.bf16.vlgmr.msra.gmra.mrb[36].mxu0 %vm1317_vm1, %v3008_v11 }
 0xbb9   :  { %2927 = vmatprep.mubr.msk.bf16.mxu0 %vm868_vm4, %v3009_v17 }
 0xc8b   :  { %v2921_v49 = vpop.f32.mrb[36].mxu0 }
 0xc8c   :  { %v2083_v9 = vadd.f32 %v2921_v49, %v2017_v25  ;;  %v2074_v29 = vpop.f32.mrb[37].mxu0 }
 0xc8d   :  { %v2075_v50 = vadd.f32 %v2074_v29, %v2007_v24  ;;  %v2922_v12 = vpop.f32.mrb[38].mxu0 }
 0xc8e   :  { %v2086_v52 = vadd.f32 %v2922_v12, %v2022_v35  ;;  %v2077_v53 = vpop.f32.mrb[39].mxu0  ;;  %v2091_v54 = vmax.f32 %v2083_v9, 0.0 }
 0xc8f   :  { %v2078_v55 = vadd.f32 %v2077_v53, %v2012_v61  ;;  %v2089_v28 = vmax.f32 %v2075_v50, 0.0 }
 0xc90   :  { %v2092_v59 = vmax.f32 %v2086_v52, 0.0 }
 0xc91   :  { %v2090_v60 = vmax.f32 %v2078_v55, 0.0 }
 0xc92   :  { %v2098_v30 = vpack.c.bf16 %v2092_v59, %v2091_v54 }
 0xc93   :  { %v2097_v44 = vpack.c.bf16 %v2090_v60, %v2089_v28 }
 0xc95   :  { %2923 = vmatprep.subr.bf16.mxu0 %v2097_v44 }
 0xc96   :  { %2924 = vmatpush3.bf16.msra.mxu0 %v2097_v44 }
 0xc97   :  { %2925 = vmatprep.subr.bf16.mxu0 %v2098_v30 }
 0xc9a   :  { %2926 = vmatpush3.bf16.msra.mxu0 %v2098_v30 }
 0xc9b   :  { %2931 = vmatprep.subr.bf16.mxu0 %v3013_v40 }
 0xc9d   :  { %2928 = vmatmul.mubr.msk.bf16.vlgmr.msra.gmra.mrb[40].mxu0 %vm868_vm4, %v3010_v27 }
 0xc9e   :  { %2935 = vmatprep.mubr.msk.bf16.mxu0 %vm3014_vm7, %v3013_v40 }
 0xd70   :  { %v2929_v42 = vpop.f32.mrb[40].mxu0 }
 0xd71   :  { %v2182_v63 = vadd.f32 %v2929_v42, %v2116_v56  ;;  %v2173_v23 = vpop.f32.mrb[41].mxu0 }
 0xd72   :  { %v2174_v15 = vadd.f32 %v2173_v23, %v2106_v14  ;;  %v2930_v33 = vpop.f32.mrb[42].mxu0 }
 0xd73   :  { %v2185_v1 = vadd.f32 %v2930_v33, %v2121_v57  ;;  %v2176_v16 = vpop.f32.mrb[43].mxu0  ;;  %v2190_v6 = vmax.f32 %v2182_v63, 0.0 }
 0xd74   :  { %v2177_v58 = vadd.f32 %v2176_v16, %v2111_v8  ;;  %v2188_v39 = vmax.f32 %v2174_v15, 0.0 }
 0xd75   :  { %v2191_v0 = vmax.f32 %v2185_v1, 0.0 }
 0xd76   :  { %v2189_v47 = vmax.f32 %v2177_v58, 0.0 }
 0xd77   :  { %v2194_v48 = vpack.c.bf16 %v2191_v0, %v2190_v6 }
 0xd78   :  { %v2193_v7 = vpack.c.bf16 %v2189_v47, %v2188_v39 }
 0xd7a   :  { %2932 = vmatpush3.bf16.msra.mxu0 %v2193_v7 }
 0xd7b   :  { %2933 = vmatprep.subr.bf16.mxu0 %v3013_v40 }
 0xd7e   :  { %2934 = vmatpush3.bf16.msra.mxu0 %v2194_v48 }
 0xd81   :  { %2936 = vmatmul.mubr.msk.bf16.vlgmr.msra.gmra.mrb[44].mxu0 %vm868_vm4, %v2192_v19 }
 0xe54   :  { %v2238_v10 = vpop.f32.mrb[44].mxu0 }
 0xe55   :  { %v2239_v34 = vadd.f32 %v2238_v10, %v2199_v20  ;;  %v2937_v45 = vpop.f32.mrb[45].mxu0 }
 0xe56   :  { %v2241_v13 = vpop.f32.mrb[46].mxu0 }
 0xe57   :  { %2244 = vst [vmem:[%s4207_s6] sm:$0xff] %v2239_v34  ;;  %v2938_v22 = vpop.f32.mrb[47].mxu0 }

</bundles_post_ra>
